<compile_context>
chip_gen: v5e
topology: v5e:2x2
jax: 0.10.0
libtpu: 0.0.40
codegen_flags: <defaults>
</compile_context>

<pallas_src>
import functools

import jax
import jax.numpy as jnp
from jax.experimental import pallas as pl
from jax.experimental.pallas import tpu as pltpu


def _convlstm_cell_kernel(rows_ref, w_ref, b_ref, c_ref, out_ref,
                          *, Ch, H, W, KH):
    # rows_ref: (1, Hp*W, K_pad)  bf16  width-only im2col of concat(x, h_cur)
    # w_ref   : (KH, K_pad, 4Ch)  bf16  per-tap-row conv weights (g cols x2)
    # b_ref   : (1, 4Ch)          f32   conv bias (g entries x2)
    # c_ref   : (1, Ch, H*W)      f32   current cell state, channel-major
    # out_ref : (1, 2Ch, H*W)     f32   packed [h_next ; c_next], channel-major
    HW = H * W

    # KH MXU matmuls; each LHS is a static, sublane-aligned slice (offsets are
    # multiples of W) of the VMEM-resident row buffer -> no relayout.
    acc = jnp.dot(rows_ref[0, 0:HW, :], w_ref[0],
                  preferred_element_type=jnp.float32)
    for kh in range(1, KH):
        acc = acc + jnp.dot(rows_ref[0, kh * W:kh * W + HW, :], w_ref[kh],
                            preferred_element_type=jnp.float32)
    acc = acc + b_ref[...]                       # f32 bias add

    # One XLU transpose to channel-major; everything downstream (gate math,
    # state update, stores) is fully lane-dense (H*W lanes wide).
    pre = jnp.transpose(acc, (1, 0))             # (4*Ch, HW) f32

    # Single EUP (sigmoid) pass for all four gates; g recovered with
    # tanh(x) = 2*sigmoid(2x) - 1 (its weights/bias were pre-doubled).
    s = jax.nn.sigmoid(pre)
    gi = s[0 * Ch:1 * Ch, :]
    gf = s[1 * Ch:2 * Ch, :]
    go = s[2 * Ch:3 * Ch, :]
    gg = 2.0 * s[3 * Ch:4 * Ch, :] - 1.0

    c_cur = c_ref[0]                             # (Ch, HW) f32
    c_next = gf * c_cur + gi * gg
    h_next = go * jnp.tanh(c_next)

    out_ref[0, 0:Ch, :] = h_next                 # unmasked, 256-lane stores
    out_ref[0, Ch:2 * Ch, :] = c_next


def prepare_params(w_hwio, bias):
    """One-time conv parameter prep (hoist out of the time loop in a rollout).

    Returns (w_k, b2):
      w_k: (KH, K_pad, 4*Ch) bf16, per-kernel-row flattened weights, K padded
           to a multiple of 128, g-gate output columns pre-scaled by 2.
      b2 : (1, 4*Ch) f32 bias with g entries pre-scaled by 2.
    """
    KH, KW, Cc, Cout = w_hwio.shape
    Ch = Cout // 4
    K = KW * Cc
    K_pad = pl.cdiv(K, 128) * 128
    # Pre-double the g gate so the kernel needs only one sigmoid pass
    # (doubling is exact in bf16/f32).
    scale = jnp.concatenate([jnp.ones((3 * Ch,), jnp.float32),
                             jnp.full((Ch,), 2.0, jnp.float32)])
    w_k = w_hwio.astype(jnp.float32).reshape(KH, K, Cout) * scale
    w_k = jnp.pad(w_k, ((0, 0), (0, K_pad - K), (0, 0))).astype(jnp.bfloat16)
    b2 = (bias.astype(jnp.float32) * scale).reshape(1, Cout)
    return w_k, b2


def conv_lstm_cell(x_nchw, h_nchw, c_nchw, w_hwio, bias):
    """ConvLSTMCell.forward with PyTorch-style NCHW inputs/outputs."""
    B, Cin, H, W = x_nchw.shape
    Ch = h_nchw.shape[1]
    KH, KW, Cc, Cout = w_hwio.shape
    assert Cc == Cin + Ch and Cout == 4 * Ch
    # PyTorch Conv2d(padding=kernel_size//2) is only 'same' for odd kernels.
    assert KH % 2 == 1 and KW % 2 == 1, "even kernel sizes not supported"
    pad_h, pad_w = KH // 2, KW // 2
    Hp = H + 2 * pad_h
    HW = H * W
    K = KW * Cc
    K_pad = pl.cdiv(K, 128) * 128

    # In a rollout this is per-call glue only because params are re-prepared;
    # hoist prepare_params() out of the scan for the per-timestep path.
    w_k, b2 = prepare_params(w_hwio, bias)

    # --- wrapper glue (fused under jit): NHWC, spatial pad, width-only im2col
    x = jnp.transpose(x_nchw, (0, 2, 3, 1))
    h = jnp.transpose(h_nchw, (0, 2, 3, 1))
    comb = jnp.concatenate([x, h], axis=-1)                       # (B,H,W,Cc)
    xpad = jnp.pad(comb, ((0, 0), (pad_h, pad_h), (pad_w, pad_w), (0, 0)))
    rows = jnp.concatenate([xpad[:, :, kw:kw + W, :] for kw in range(KW)],
                           axis=-1)                               # (B,Hp,W,KW*Cc)
    rows = jnp.pad(rows, ((0, 0), (0, 0), (0, 0), (0, K_pad - K)))
    rows = rows.reshape(B, Hp * W, K_pad).astype(jnp.bfloat16)

    # Cell state stays f32 and channel-major (Ch, H*W): fully lane-dense DMA.
    c_in = c_nchw.reshape(B, Ch, HW).astype(jnp.float32)

    kernel = functools.partial(_convlstm_cell_kernel, Ch=Ch, H=H, W=W, KH=KH)

    out = pl.pallas_call(
        kernel,
        out_shape=jax.ShapeDtypeStruct((B, 2 * Ch, HW), jnp.float32),
        grid_spec=pltpu.PrefetchScalarGridSpec(
            num_scalar_prefetch=0,
            grid=(B,),
            in_specs=[
                pl.BlockSpec((1, Hp * W, K_pad), lambda b: (b, 0, 0)),
                pl.BlockSpec((KH, K_pad, Cout), lambda b: (0, 0, 0)),
                pl.BlockSpec((1, Cout), lambda b: (0, 0)),
                pl.BlockSpec((1, Ch, HW), lambda b: (b, 0, 0)),
            ],
            out_specs=pl.BlockSpec((1, 2 * Ch, HW), lambda b: (b, 0, 0)),
        ),
        compiler_params=pltpu.CompilerParams(
            dimension_semantics=("parallel",)),
    )(rows, w_k, b2, c_in)

    # Free (row-major) reshapes straight back to NCHW; c stays f32.
    h_next = out[:, :Ch, :].reshape(B, Ch, H, W).astype(x_nchw.dtype)
    c_next = out[:, Ch:, :].reshape(B, Ch, H, W)
    return h_next, c_next


def _reference(x_nchw, h_nchw, c_nchw, w_hwio, bias,
               matmul_dtype=jnp.float32):
    """Pure-JAX reference (semantically equal to the PyTorch module).

    matmul_dtype=bf16 reproduces the kernel's matmul precision (bf16 operands,
    f32 accumulation); f32 is the exact PyTorch semantics.
    """
    x = jnp.transpose(x_nchw, (0, 2, 3, 1))
    h = jnp.transpose(h_nchw, (0, 2, 3, 1))
    c = jnp.transpose(c_nchw, (0, 2, 3, 1))
    combined = jnp.concatenate([x, h], axis=-1).astype(matmul_dtype)
    conv = jax.lax.conv_general_dilated(
        combined, w_hwio.astype(matmul_dtype),
        window_strides=(1, 1), padding="SAME",
        dimension_numbers=("NHWC", "HWIO", "NHWC"),
        preferred_element_type=jnp.float32) + bias
    cc_i, cc_f, cc_o, cc_g = jnp.split(conv, 4, axis=-1)
    i = jax.nn.sigmoid(cc_i)
    f = jax.nn.sigmoid(cc_f)
    o = jax.nn.sigmoid(cc_o)
    g = jnp.tanh(cc_g)
    c_next = f * c + i * g
    h_next = o * jnp.tanh(c_next)
    return (jnp.transpose(h_next, (0, 3, 1, 2)),
            jnp.transpose(c_next, (0, 3, 1, 2)))


if __name__ == "__main__":
    # Module config: input_size=(16,16), input_dim=4, hidden_dim=32,
    # kernel_size=(3,3), bias=True, use_bn=False, convs_per_cell=1
    B, Cin, Ch, H, W = 2, 4, 32, 16, 16
    KH = KW = 3

    key = jax.random.PRNGKey(0)
    k1, k2, k3, k4, k5 = jax.random.split(key, 5)
    x = jax.random.normal(k1, (B, Cin, H, W), jnp.float32)
    h0 = jax.random.normal(k2, (B, Ch, H, W), jnp.float32)
    c0 = jax.random.normal(k3, (B, Ch, H, W), jnp.float32)
    # deterministic synthetic conv parameters (HWIO)
    w = 0.05 * jax.random.normal(k4, (KH, KW, Cin + Ch, 4 * Ch), jnp.float32)
    b = 0.05 * jax.random.normal(k5, (4 * Ch,), jnp.float32)

    fwd = jax.jit(conv_lstm_cell)
    h_next, c_next = fwd(x, h0, c0, w, b)
    jax.block_until_ready((h_next, c_next))

    assert h_next.shape == (B, Ch, H, W) and c_next.shape == (B, Ch, H, W)

    # Tight check against a reference with matching matmul precision
    # (bf16 operands, f32 accumulation): differences are only f32 sum order
    # and the (exact-in-exact-arithmetic) tanh(x) = 2*sigmoid(2x)-1 identity.
    h_bf, c_bf = _reference(x, h0, c0, w, b, matmul_dtype=jnp.bfloat16)
    assert jnp.allclose(h_next, h_bf, atol=1e-4, rtol=1e-4), "h mismatch (bf16 ref)"
    assert jnp.allclose(c_next, c_bf, atol=1e-4, rtol=1e-4), "c mismatch (bf16 ref)"

    # Sanity check against the exact f32 PyTorch semantics, at a tolerance
    # appropriate for the bf16 matmul operands.
    h_f32, c_f32 = _reference(x, h0, c0, w, b, matmul_dtype=jnp.float32)
    assert jnp.allclose(h_next, h_f32, atol=5e-2, rtol=5e-2), "h mismatch (f32 ref)"
    assert jnp.allclose(c_next, c_f32, atol=5e-2, rtol=5e-2), "c mismatch (f32 ref)"

    print("KERNEL_OK")
</pallas_src>

<mosaic_0001>
module attributes {stable_mosaic.version = 11 : i64} {
  func.func @_convlstm_cell_kernel(%arg0: i32, %arg1: memref<1x288x128xbf16, #tpu.memory_space<vmem>>, %arg2: memref<3x128x128xbf16, #tpu.memory_space<vmem>>, %arg3: memref<1x128xf32, #tpu.memory_space<vmem>>, %arg4: memref<1x32x256xf32, #tpu.memory_space<vmem>>, %arg5: memref<1x64x256xf32, #tpu.memory_space<vmem>>) attributes {dimension_semantics = [#tpu.dimension_semantics<parallel>], iteration_bounds = array<i64: 2>, scalar_prefetch = 0 : i64, scratch_operands = 0 : i64, tpu.core_type = #tpu.core_type<tc>, window_params = [{transform_indices = @transform_0, window_bounds = array<i64: 1, 288, 128>}, {pipeline_mode = #tpu.pipeline_mode<synchronous>, transform_indices = @transform_1, window_bounds = array<i64: 3, 128, 128>}, {pipeline_mode = #tpu.pipeline_mode<synchronous>, transform_indices = @transform_2, window_bounds = array<i64: 1, 128>}, {transform_indices = @transform_3, window_bounds = array<i64: 1, 32, 256>}, {transform_indices = @transform_4, window_bounds = array<i64: 1, 64, 256>}]} {
    %c0 = arith.constant 0 : index
    %c0_0 = arith.constant 0 : index
    %c0_1 = arith.constant 0 : index
    %0 = vector.load %arg1[%c0, %c0_0, %c0_1] : memref<1x288x128xbf16, #tpu.memory_space<vmem>>, vector<1x256x128xbf16>
    %1 = vector.shape_cast %0 : vector<1x256x128xbf16> to vector<256x128xbf16>
    %c0_2 = arith.constant 0 : index
    %c0_3 = arith.constant 0 : index
    %c0_4 = arith.constant 0 : index
    %2 = vector.load %arg2[%c0_2, %c0_3, %c0_4] : memref<3x128x128xbf16, #tpu.memory_space<vmem>>, vector<1x128x128xbf16>
    %3 = vector.shape_cast %2 : vector<1x128x128xbf16> to vector<128x128xbf16>
    %cst = arith.constant dense<0.000000e+00> : vector<256x128xf32>
    %4 = tpu.matmul %1, %3, %cst {dimension_numbers = #tpu.dot_dimension_numbers<[1], [0], [0], [1], [0, 0, 1, 1], [], []>} : vector<256x128xbf16>, vector<128x128xbf16>, vector<256x128xf32> -> vector<256x128xf32>
    %c0_5 = arith.constant 0 : index
    %c16 = arith.constant 16 : index
    %c0_6 = arith.constant 0 : index
    %5 = vector.load %arg1[%c0_5, %c16, %c0_6] : memref<1x288x128xbf16, #tpu.memory_space<vmem>>, vector<1x256x128xbf16>
    %6 = vector.shape_cast %5 : vector<1x256x128xbf16> to vector<256x128xbf16>
    %c1 = arith.constant 1 : index
    %c0_7 = arith.constant 0 : index
    %c0_8 = arith.constant 0 : index
    %7 = vector.load %arg2[%c1, %c0_7, %c0_8] : memref<3x128x128xbf16, #tpu.memory_space<vmem>>, vector<1x128x128xbf16>
    %8 = vector.shape_cast %7 : vector<1x128x128xbf16> to vector<128x128xbf16>
    %cst_9 = arith.constant dense<0.000000e+00> : vector<256x128xf32>
    %9 = tpu.matmul %6, %8, %cst_9 {dimension_numbers = #tpu.dot_dimension_numbers<[1], [0], [0], [1], [0, 0, 1, 1], [], []>} : vector<256x128xbf16>, vector<128x128xbf16>, vector<256x128xf32> -> vector<256x128xf32>
    %10 = arith.addf %4, %9 : vector<256x128xf32>
    %c0_10 = arith.constant 0 : index
    %c32 = arith.constant 32 : index
    %c0_11 = arith.constant 0 : index
    %11 = vector.load %arg1[%c0_10, %c32, %c0_11] : memref<1x288x128xbf16, #tpu.memory_space<vmem>>, vector<1x256x128xbf16>
    %12 = vector.shape_cast %11 : vector<1x256x128xbf16> to vector<256x128xbf16>
    %c2 = arith.constant 2 : index
    %c0_12 = arith.constant 0 : index
    %c0_13 = arith.constant 0 : index
    %13 = vector.load %arg2[%c2, %c0_12, %c0_13] : memref<3x128x128xbf16, #tpu.memory_space<vmem>>, vector<1x128x128xbf16>
    %14 = vector.shape_cast %13 : vector<1x128x128xbf16> to vector<128x128xbf16>
    %cst_14 = arith.constant dense<0.000000e+00> : vector<256x128xf32>
    %15 = tpu.matmul %12, %14, %cst_14 {dimension_numbers = #tpu.dot_dimension_numbers<[1], [0], [0], [1], [0, 0, 1, 1], [], []>} : vector<256x128xbf16>, vector<128x128xbf16>, vector<256x128xf32> -> vector<256x128xf32>
    %16 = arith.addf %10, %15 : vector<256x128xf32>
    %c0_15 = arith.constant 0 : index
    %c0_16 = arith.constant 0 : index
    %17 = vector.load %arg3[%c0_15, %c0_16] : memref<1x128xf32, #tpu.memory_space<vmem>>, vector<1x128xf32>
    %18 = vector.broadcast %17 : vector<1x128xf32> to vector<256x128xf32>
    %19 = arith.addf %16, %18 : vector<256x128xf32>
    %20 = tpu.transpose %19, [1, 0] : vector<256x128xf32> -> vector<128x256xf32>
    %21 = arith.negf %20 : vector<128x256xf32>
    %22 = math.exp %21 : vector<128x256xf32>
    %cst_17 = arith.constant 1.000000e+00 : f32
    %23 = vector.broadcast %cst_17 : f32 to vector<128x256xf32>
    %24 = arith.addf %23, %22 : vector<128x256xf32>
    %25 = arith.divf %23, %24 : vector<128x256xf32>
    %26 = vector.extract_strided_slice %25 {offsets = [0, 0], sizes = [32, 256], strides = [1, 1]} : vector<128x256xf32> to vector<32x256xf32>
    %27 = vector.extract_strided_slice %25 {offsets = [32, 0], sizes = [32, 256], strides = [1, 1]} : vector<128x256xf32> to vector<32x256xf32>
    %28 = vector.extract_strided_slice %25 {offsets = [64, 0], sizes = [32, 256], strides = [1, 1]} : vector<128x256xf32> to vector<32x256xf32>
    %29 = vector.extract_strided_slice %25 {offsets = [96, 0], sizes = [32, 256], strides = [1, 1]} : vector<128x256xf32> to vector<32x256xf32>
    %cst_18 = arith.constant 2.000000e+00 : f32
    %30 = vector.broadcast %cst_18 : f32 to vector<32x256xf32>
    %31 = arith.mulf %30, %29 : vector<32x256xf32>
    %cst_19 = arith.constant 1.000000e+00 : f32
    %32 = vector.broadcast %cst_19 : f32 to vector<32x256xf32>
    %33 = arith.subf %31, %32 : vector<32x256xf32>
    %c0_20 = arith.constant 0 : index
    %c0_21 = arith.constant 0 : index
    %c0_22 = arith.constant 0 : index
    %34 = vector.load %arg4[%c0_20, %c0_21, %c0_22] : memref<1x32x256xf32, #tpu.memory_space<vmem>>, vector<1x32x256xf32>
    %35 = vector.shape_cast %34 : vector<1x32x256xf32> to vector<32x256xf32>
    %36 = arith.mulf %27, %35 : vector<32x256xf32>
    %37 = arith.mulf %26, %33 : vector<32x256xf32>
    %38 = arith.addf %36, %37 : vector<32x256xf32>
    %39 = math.tanh %38 : vector<32x256xf32>
    %40 = arith.mulf %28, %39 : vector<32x256xf32>
    %c0_23 = arith.constant 0 : index
    %c0_24 = arith.constant 0 : index
    %c0_25 = arith.constant 0 : index
    %41 = vector.load %arg5[%c0_23, %c0_24, %c0_25] : memref<1x64x256xf32, #tpu.memory_space<vmem>>, vector<1x32x256xf32>
    %42 = vector.shape_cast %41 : vector<1x32x256xf32> to vector<32x256xf32>
    %43 = vector.shape_cast %40 : vector<32x256xf32> to vector<1x32x256xf32>
    tpu.vector_store %arg5[%c0_23, %c0_24, %c0_25], %43 {strides = array<i32>} : memref<1x64x256xf32, #tpu.memory_space<vmem>>, vector<1x32x256xf32>,
    %c0_26 = arith.constant 0 : index
    %c32_27 = arith.constant 32 : index
    %c0_28 = arith.constant 0 : index
    %44 = vector.load %arg5[%c0_26, %c32_27, %c0_28] : memref<1x64x256xf32, #tpu.memory_space<vmem>>, vector<1x32x256xf32>
    %45 = vector.shape_cast %44 : vector<1x32x256xf32> to vector<32x256xf32>
    %46 = vector.shape_cast %38 : vector<32x256xf32> to vector<1x32x256xf32>
    tpu.vector_store %arg5[%c0_26, %c32_27, %c0_28], %46 {strides = array<i32>} : memref<1x64x256xf32, #tpu.memory_space<vmem>>, vector<1x32x256xf32>,
    return
  }
  func.func @transform_0(%arg0: i32) -> (i32, i32, i32) {
    %c0_i32 = arith.constant 0 : i32
    %c0_i32_0 = arith.constant 0 : i32
    %c0_i32_1 = arith.constant 0 : i32
    return %arg0, %c0_i32, %c0_i32_0 : i32, i32, i32
  }
  func.func @transform_1(%arg0: i32) -> (i32, i32, i32) {
    %c0_i32 = arith.constant 0 : i32
    %c0_i32_0 = arith.constant 0 : i32
    %c0_i32_1 = arith.constant 0 : i32
    %c0_i32_2 = arith.constant 0 : i32
    return %c0_i32, %c0_i32_0, %c0_i32_1 : i32, i32, i32
  }
  func.func @transform_2(%arg0: i32) -> (i32, i32) {
    %c0_i32 = arith.constant 0 : i32
    %c0_i32_0 = arith.constant 0 : i32
    %c0_i32_1 = arith.constant 0 : i32
    return %c0_i32, %c0_i32_0 : i32, i32
  }
  func.func @transform_3(%arg0: i32) -> (i32, i32, i32) {
    %c0_i32 = arith.constant 0 : i32
    %c0_i32_0 = arith.constant 0 : i32
    %c0_i32_1 = arith.constant 0 : i32
    return %arg0, %c0_i32, %c0_i32_0 : i32, i32, i32
  }
  func.func @transform_4(%arg0: i32) -> (i32, i32, i32) {
    %c0_i32 = arith.constant 0 : i32
    %c0_i32_0 = arith.constant 0 : i32
    %c0_i32_1 = arith.constant 0 : i32
    return %arg0, %c0_i32, %c0_i32_0 : i32, i32, i32
  }
}

</mosaic_0001>

<bundles_post_ra>
// kernel: conv_lstm_cell.1
= control target key start
LH: loop header
LB: loop body
LE: loop exit
PB: predicated region body
PF: predicated region fallthrough
CT: control target
= control target key end

     0   :  { %s2412_s15 = smov 0   ;;  %s3485_s0 = inlined_call_operand.vmem [shape: bf16[2,288,128], index: 0, kind: input, shape index: {}]   ;;  %s3486_s1 = inlined_call_operand.vmem [shape: bf16[3,128,128], index: 1, kind: input, shape index: {}]   ;;  %s3487_s2 = inlined_call_operand.vmem [shape: f32[1,128], index: 2, kind: input, shape index: {}]   ;;  %s3488_s3 = inlined_call_operand.vmem [shape: f32[2,32,256], index: 3, kind: input, shape index: {}]   ;;  %s3489_s4 = inlined_call_operand.vmem [shape: f32[2,64,256], index: 4, kind: output, shape index: {}]  }
   0x1 LB: > { %s1830_s16 = sadd.s32 4294967295, %s2385_s15   ;;  %p1834_p0 = scmp.ge.s32.totalorder %s2385_s15, 1  ;;  %s2385_s15 = sphi %s2412_s15, %s14_s15  }
   0x2   : > { %p172_p1 = scmp.lt.s32.totalorder %s2385_s15, 3 }
   0x4   : > { %p173_p2 = pnand %p1834_p0, %p172_p1 }
   0x5   : > { %p203_p3 = scmp.lt.s32.totalorder (!%p173_p2), %s1830_s16, 1 }
   0x6   : > { %176 = sbr.rel (%p173_p2) target bundleno = 640 (0x280), region = 36 }
   0xb   : > { %v2176_v0 = vld [vmem:[%s3486_s1 + $0x78] sm:$0xff]  ;;  %v2175_v3 = vld [vmem:[%s3486_s1 + $0x70] sm:$0xff]  ;;  %v2174_v6 = vld [vmem:[%s3486_s1 + $0x68] sm:$0xff]  ;;  %s3571_s16 = smov (!%p203_p3, %s1830_s16), 1 }
   0xc   : > { %v2167_v1 = vld [vmem:[%s3486_s1 + $0x38] sm:$0xff]  ;;  %429 = vmatpush.bf16.msra.mxu0 %v2176_v0  ;;  %2201 = vmatpush.bf16.msra.mxu3 %v2176_v0  ;;  %v2166_v4 = vld [vmem:[%s3486_s1 + $0x30] sm:$0xff]  ;;  %v2165_v7 = vld [vmem:[%s3486_s1 + $0x28] sm:$0xff]  ;;  %s2225_s5 = smul.u32 144, %s3571_s16  ;;  %s2142_s23 = sshll.u32 %s3571_s16, 6 }
   0xd   : > { %v2429_v2 = vld [vmem:[%s3486_s1 + $0xb8] sm:$0xff]  ;;  %572 = vmatpush.bf16.msra.mxu1 %v2167_v1  ;;  %v2441_v5 = vld [vmem:[%s3486_s1 + $0xb0] sm:$0xff]  ;;  %v2453_v8 = vld [vmem:[%s3486_s1 + $0xa8] sm:$0xff]  ;;  %s2877_s26 = scalar_lea.vmem %s3488_s3, %s2142_s23  ;;  %s2143_s27 = sshll.u32 %s3571_s16, 7 }
   0xe   : > { %854 = vmatpush.bf16.msra.mxu2 %v2429_v2  ;;  %v2173_v9 = vld [vmem:[%s3486_s1 + $0x60] sm:$0xff]  ;;  %v2172_v12 = vld [vmem:[%s3486_s1 + $0x58] sm:$0xff]  ;;  %v2171_v15 = vld [vmem:[%s3486_s1 + $0x50] sm:$0xff]  ;;  %s2511_s14 = scalar_lea.vmem %s3485_s0, %s2225_s5  ;;  %s2944_s29 = scalar_lea.vmem %s3489_s4, %s2143_s27 }
   0xf   : > { %v2164_v10 = vld [vmem:[%s3486_s1 + $0x20] sm:$0xff]  ;;  %v2163_v13 = vld [vmem:[%s3486_s1 + $0x18] sm:$0xff]  ;;  %v2162_v16 = vld [vmem:[%s3486_s1 + $0x10] sm:$0xff] }
  0x10   : > { %430 = vmatpush.bf16.msra.mxu0 %v2175_v3  ;;  %2202 = vmatpush.bf16.msra.mxu3 %v2175_v3  ;;  %v2465_v11 = vld [vmem:[%s3486_s1 + $0xa0] sm:$0xff]  ;;  %v2479_v14 = vld [vmem:[%s3486_s1 + $0x98] sm:$0xff]  ;;  %v2195_v17 = vld [vmem:[%s3486_s1 + $0x90] sm:$0xff] }
  0x11   : > { %573 = vmatpush.bf16.msra.mxu1 %v2166_v4  ;;  %v2170_v18 = vld [vmem:[%s3486_s1 + $0x48] sm:$0xff]  ;;  %v2169_v21 = vld [vmem:[%s3486_s1 + $0x40] sm:$0xff]  ;;  %v2177_v27 = vld [vmem:[%s2511_s14 + $0x10] sm:$0xff] }
  0x12   : > { %855 = vmatpush.bf16.msra.mxu2 %v2441_v5  ;;  %v2161_v19 = vld [vmem:[%s3486_s1 + $0x8] sm:$0xff]  ;;  %v2160_v22 = vld [vmem:[%s3486_s1] sm:$0xff]  ;;  %v2146_v28 = vld [vmem:[%s2511_s14 + $0x10] sm:$0xff] }
  0x13   : > { %v2194_v20 = vld [vmem:[%s3486_s1 + $0x88] sm:$0xff]  ;;  %v2193_v23 = vld [vmem:[%s3486_s1 + $0x80] sm:$0xff]  ;;  %v2158_v29 = vld [vmem:[%s2511_s14 + $0x70] sm:$0xff] }
  0x14   : > { %431 = vmatpush.bf16.msra.mxu0 %v2174_v6  ;;  %2203 = vmatpush.bf16.msra.mxu3 %v2174_v6  ;;  %v2145_v24 = vld [vmem:[%s2511_s14 + $0x8] sm:$0xff]  ;;  %v2144_v26 = vld [vmem:[%s2511_s14] sm:$0xff]  ;;  %v2178_v30 = vld [vmem:[%s2511_s14 + $0x18] sm:$0xff] }
  0x15   : > { %574 = vmatpush.bf16.msra.mxu1 %v2165_v7  ;;  %v2157_v25 = vld [vmem:[%s2511_s14 + $0x68] sm:$0xff]  ;;  %v2147_v31 = vld [vmem:[%s2511_s14 + $0x18] sm:$0xff]  ;;  %v2179_v33 = vld [vmem:[%s2511_s14 + $0x20] sm:$0xff] }
  0x16   : > { %856 = vmatpush.bf16.msra.mxu2 %v2453_v8  ;;  %v2159_v32 = vld [vmem:[%s2511_s14 + $0x78] sm:$0xff]  ;;  %v2148_v34 = vld [vmem:[%s2511_s14 + $0x20] sm:$0xff]  ;;  %v2180_v36 = vld [vmem:[%s2511_s14 + $0x28] sm:$0xff] }
  0x17   : > { %v2168_v35 = vld [vmem:[%s2511_s14 + $0x80] sm:$0xff]  ;;  %v2149_v37 = vld [vmem:[%s2511_s14 + $0x28] sm:$0xff]  ;;  %v2181_v39 = vld [vmem:[%s2511_s14 + $0x30] sm:$0xff] }
  0x18   : > { %432 = vmatpush.bf16.msra.mxu0 %v2173_v9  ;;  %2204 = vmatpush.bf16.msra.mxu3 %v2173_v9  ;;  %v2539_v38 = vld [vmem:[%s2511_s14 + $0x60] sm:$0xff]  ;;  %v2150_v40 = vld [vmem:[%s2511_s14 + $0x30] sm:$0xff]  ;;  %v2182_v41 = vld [vmem:[%s2511_s14 + $0x38] sm:$0xff] }
  0x19   : > { %575 = vmatpush.bf16.msra.mxu1 %v2164_v10  ;;  %v2151_v42 = vld [vmem:[%s2511_s14 + $0x38] sm:$0xff]  ;;  %v2183_v43 = vld [vmem:[%s2511_s14 + $0x40] sm:$0xff]  ;;  %v2184_v45 = vld [vmem:[%s2511_s14 + $0x48] sm:$0xff] }
  0x1a   : > { %857 = vmatpush.bf16.msra.mxu2 %v2465_v11  ;;  %v2152_v44 = vld [vmem:[%s2511_s14 + $0x40] sm:$0xff]  ;;  %v2153_v46 = vld [vmem:[%s2511_s14 + $0x48] sm:$0xff]  ;;  %v2189_v47 = vld [vmem:[%s2511_s14 + $0x70] sm:$0xff] }
  0x1b   : > { %v2185_v49 = vld [vmem:[%s2511_s14 + $0x50] sm:$0xff]  ;;  %v2555_v52 = vld [vmem:[%s3487_s2] ss:$0 sm:$0xff]  ;;  %v2190_v61 = vld [vmem:[%s2511_s14 + $0x78] sm:$0xff] }
  0x1c   : > { %433 = vmatpush.bf16.msra.mxu0 %v2172_v12  ;;  %2205 = vmatpush.bf16.msra.mxu3 %v2172_v12  ;;  %v2154_v60 = vld [vmem:[%s2511_s14 + $0x50] sm:$0xff]  ;;  %v2186_v0 = vld [vmem:[%s2511_s14 + $0x58] sm:$0xff] }
  0x1d   : > { %576 = vmatpush.bf16.msra.mxu1 %v2163_v13 }
  0x1e   : > { %858 = vmatpush.bf16.msra.mxu2 %v2479_v14 }
  0x20   : > { %434 = vmatpush.bf16.msra.mxu0 %v2171_v15  ;;  %2206 = vmatpush.bf16.msra.mxu3 %v2171_v15 }
  0x21   : > { %577 = vmatpush.bf16.msra.mxu1 %v2162_v16 }
  0x22   : > { %859 = vmatpush.bf16.msra.mxu2 %v2195_v17 }
  0x24   : > { %435 = vmatpush.bf16.msra.mxu0 %v2170_v18  ;;  %2207 = vmatpush.bf16.msra.mxu3 %v2170_v18 }
  0x25   : > { %578 = vmatpush.bf16.msra.mxu1 %v2161_v19 }
  0x26   : > { %860 = vmatpush.bf16.msra.mxu2 %v2194_v20 }
  0x28   : > { %436 = vmatpush.bf16.msra.mxu0 %v2169_v21  ;;  %2208 = vmatpush.bf16.msra.mxu3 %v2169_v21 }
  0x29   : > { %579 = vmatpush.bf16.msra.mxu1 %v2160_v22 }
  0x2a   : > { %861 = vmatpush.bf16.msra.mxu2 %v2193_v23 }
  0x2b   : > { %437 = vmatmul.bf16.vlgmr.msra.gmra.mxu0 %v2145_v24  ;;  %497 = vmatmul.bf16.vlgmr.msra.gmra.mxu3 %v2157_v25 }
  0x2c   : > { %2209 = vmatpush.bf16.msrb.mxu3 %v2167_v1  ;;  %580 = vmatmul.bf16.vlgmr.msra.gmra.mxu1 %v2144_v26 }
  0x2d   : > { %862 = vmatmul.bf16.vlgmr.msra.gmra.mxu2 %v2177_v27 }
  0x30   : > { %2210 = vmatpush.bf16.msrb.mxu3 %v2166_v4 }
  0x34   : > { %2211 = vmatpush.bf16.msrb.mxu3 %v2165_v7 }
  0x38   : > { %2212 = vmatpush.bf16.msrb.mxu3 %v2164_v10 }
  0x3b   : > { %442 = vmatmul.bf16.gmra.mxu0 %v2146_v28  ;;  %502 = vmatmul.bf16.gmra.mxu3 %v2158_v29 }
  0x3c   : > { %2213 = vmatpush.bf16.msrb.mxu3 %v2163_v13  ;;  %585 = vmatmul.bf16.gmra.mxu1 %v2145_v24  ;;  %v2155_v13 = vld [vmem:[%s2511_s14 + $0x58] sm:$0xff] }
  0x3d   : > { %867 = vmatmul.bf16.gmra.mxu2 %v2178_v30 }
  0x40   : > { %2214 = vmatpush.bf16.msrb.mxu3 %v2162_v16 }
  0x44   : > { %2215 = vmatpush.bf16.msrb.mxu3 %v2161_v19 }
  0x48   : > { %2216 = vmatpush.bf16.msrb.mxu3 %v2160_v22 }
  0x4b   : > { %447 = vmatmul.bf16.gmra.mxu0 %v2147_v31  ;;  %507 = vmatmul.bf16.gmra.mxu3 %v2159_v32 }
  0x4c   : > { %2217 = vmatpush.bf16.msra.mxu3 %v2429_v2  ;;  %590 = vmatmul.bf16.gmra.mxu1 %v2146_v28 }
  0x4d   : > { %872 = vmatmul.bf16.gmra.mxu2 %v2179_v33 }
  0x50   : > { %2218 = vmatpush.bf16.msra.mxu3 %v2441_v5 }
  0x54   : > { %2219 = vmatpush.bf16.msra.mxu3 %v2453_v8 }
  0x58   : > { %2220 = vmatpush.bf16.msra.mxu3 %v2465_v11 }
  0x5b   : > { %452 = vmatmul.bf16.gmra.mxu0 %v2148_v34  ;;  %512 = vmatmul.bf16.gmra.mxu3 %v2168_v35 }
  0x5c   : > { %2221 = vmatpush.bf16.msra.mxu3 %v2479_v14  ;;  %595 = vmatmul.bf16.gmra.mxu1 %v2147_v31  ;;  %v2191_v14 = vld [vmem:[%s2511_s14 + $0x80] sm:$0xff] }
  0x5d   : > { %877 = vmatmul.bf16.gmra.mxu2 %v2180_v36 }
  0x60   : > { %2222 = vmatpush.bf16.msra.mxu3 %v2195_v17  ;;  %v2187_v17 = vld [vmem:[%s2511_s14 + $0x60] sm:$0xff] }
  0x64   : > { %2223 = vmatpush.bf16.msra.mxu3 %v2194_v20 }
  0x68   : > { %2224 = vmatpush.bf16.msra.mxu3 %v2193_v23 }
  0x6b   : > { %457 = vmatmul.bf16.gmra.mxu0 %v2149_v37  ;;  %640 = vmatmul.bf16.vlgmr.msrb.gmra.mxu3 %v2539_v38 }
  0x6c   : > { %600 = vmatmul.bf16.gmra.mxu1 %v2148_v34 }
  0x6d   : > { %882 = vmatmul.bf16.gmra.mxu2 %v2181_v39 }
  0x7b   : > { %462 = vmatmul.bf16.gmra.mxu0 %v2150_v40  ;;  %645 = vmatmul.bf16.gmra.mxu3 %v2157_v25 }
  0x7c   : > { %605 = vmatmul.bf16.gmra.mxu1 %v2149_v37 }
  0x7d   : > { %887 = vmatmul.bf16.gmra.mxu2 %v2182_v41 }
  0x8b   : > { %467 = vmatmul.bf16.gmra.mxu0 %v2151_v42  ;;  %650 = vmatmul.bf16.gmra.mxu3 %v2158_v29  ;;  %v2192_v29 = vld [vmem:[%s2511_s14 + $0x88] sm:$0xff] }
  0x8c   : > { %610 = vmatmul.bf16.gmra.mxu1 %v2150_v40 }
  0x8d   : > { %892 = vmatmul.bf16.gmra.mxu2 %v2183_v43 }
  0x9b   : > { %472 = vmatmul.bf16.gmra.mxu0 %v2152_v44  ;;  %655 = vmatmul.bf16.gmra.mxu3 %v2159_v32  ;;  %v2188_v32 = vld [vmem:[%s2511_s14 + $0x68] sm:$0xff] }
  0x9c   : > { %615 = vmatmul.bf16.gmra.mxu1 %v2151_v42 }
  0x9d   : > { %897 = vmatmul.bf16.gmra.mxu2 %v2184_v45 }
  0xa8   : > { %v438_v48 = vpop.f32.mrf.mxu0 }
  0xa9   : > { %v581_v50 = vpop.f32.mrf.mxu1 }
  0xaa   : > { %v582_v51 = vadd.f32 %v581_v50, %v438_v48 }
  0xab   : > { %477 = vmatmul.bf16.gmra.mxu0 %v2153_v46  ;;  %922 = vmatmul.bf16.vlgmr.msra.gmra.mxu3 %v2189_v47 }
  0xac   : > { %620 = vmatmul.bf16.gmra.mxu1 %v2152_v44 }
  0xad   : > { %902 = vmatmul.bf16.gmra.mxu2 %v2185_v49 }
  0xae   : > { %v2562_v4 = vpop.f32.mrf.mxu3 }
  0xb0   : > { %v863_v53 = vpop.f32.mrf.mxu2  ;;  %v440_v55 = vpop.f32.mrf.mxu0 }
  0xb1   : > { %v943_v54 = vadd.f32 %v863_v53, %v582_v51  ;;  %v583_v56 = vpop.f32.mrf.mxu1 }
  0xb2   : > { %v584_v58 = vadd.f32 %v583_v56, %v440_v55 }
  0xb3   : > { %v979_v57 = vadd.f32 %v2555_v52, %v943_v54 }
  0xb5   : > { %1011 = vxpose.xlu0.b32.start [1/16] %v979_v57, 128 }
  0xb6   : > { %v2565_v11 = vpop.f32.mrf.mxu3 }
  0xb8   : > { %v865_v59 = vpop.f32.mrf.mxu2  ;;  %v443_v63 = vpop.f32.mrf.mxu0 }
  0xb9   : > { %v944_v62 = vadd.f32 %v865_v59, %v584_v58  ;;  %v586_v1 = vpop.f32.mrf.mxu1 }
  0xba   : > { %v587_v3 = vadd.f32 %v586_v1, %v443_v63 }
  0xbb   : > { %v980_v2 = vadd.f32 %v2555_v52, %v944_v62  ;;  %482 = vmatmul.bf16.gmra.mxu0 %v2154_v60  ;;  %927 = vmatmul.bf16.gmra.mxu3 %v2190_v61 }
  0xbc   : > { %625 = vmatmul.bf16.gmra.mxu1 %v2153_v46 }
  0xbd   : > { %907 = vmatmul.bf16.gmra.mxu2 %v2186_v0  ;;  %1012 = vxpose.xlu0.b32.cont [2/16] %v980_v2, 128 }
  0xbe   : > { %v2571_v24 = vpop.f32.mrf.mxu3 }
  0xc0   : > { %v868_v5 = vpop.f32.mrf.mxu2  ;;  %v445_v7 = vpop.f32.mrf.mxu0 }
  0xc1   : > { %v945_v6 = vadd.f32 %v868_v5, %v587_v3  ;;  %v588_v8 = vpop.f32.mrf.mxu1 }
  0xc2   : > { %v589_v10 = vadd.f32 %v588_v8, %v445_v7 }
  0xc3   : > { %v981_v9 = vadd.f32 %v2555_v52, %v945_v6 }
  0xc5   : > { %1013 = vxpose.xlu0.b32.cont [3/16] %v981_v9, 128 }
  0xc6   : > { %v2577_v35 = vpop.f32.mrf.mxu3 }
  0xc8   : > { %v870_v12 = vpop.f32.mrf.mxu2  ;;  %v448_v16 = vpop.f32.mrf.mxu0 }
  0xc9   : > { %v946_v15 = vadd.f32 %v870_v12, %v589_v10  ;;  %v591_v18 = vpop.f32.mrf.mxu1 }
  0xca   : > { %v592_v20 = vadd.f32 %v591_v18, %v448_v16 }
  0xcb   : > { %v982_v19 = vadd.f32 %v2555_v52, %v946_v15  ;;  %487 = vmatmul.bf16.gmra.mxu0 %v2155_v13  ;;  %932 = vmatmul.bf16.gmra.mxu3 %v2191_v14 }
  0xcc   : > { %630 = vmatmul.bf16.gmra.mxu1 %v2154_v60 }
  0xcd   : > { %912 = vmatmul.bf16.gmra.mxu2 %v2187_v17  ;;  %1014 = vxpose.xlu0.b32.cont [4/16] %v982_v19, 128 }
  0xce   : > { %v2581_v43 = vpop.f32.mrf.mxu3 }
  0xd0   : > { %v873_v21 = vpop.f32.mrf.mxu2  ;;  %v450_v23 = vpop.f32.mrf.mxu0 }
  0xd1   : > { %v947_v22 = vadd.f32 %v873_v21, %v592_v20  ;;  %v593_v25 = vpop.f32.mrf.mxu1 }
  0xd2   : > { %v594_v27 = vadd.f32 %v593_v25, %v450_v23 }
  0xd3   : > { %v983_v26 = vadd.f32 %v2555_v52, %v947_v22 }
  0xd5   : > { %1015 = vxpose.xlu0.b32.cont [5/16] %v983_v26, 128 }
  0xd6   : > { %v2584_v50 = vpop.f32.mrf.mxu3 }
  0xd8   : > { %v875_v28 = vpop.f32.mrf.mxu2  ;;  %v453_v31 = vpop.f32.mrf.mxu0 }
  0xd9   : > { %v948_v30 = vadd.f32 %v875_v28, %v594_v27  ;;  %v596_v33 = vpop.f32.mrf.mxu1 }
  0xda   : > { %v597_v36 = vadd.f32 %v596_v33, %v453_v31 }
  0xdb   : > { %v984_v34 = vadd.f32 %v2555_v52, %v948_v30  ;;  %492 = vmatmul.bf16.gmra.mxu0 %v2539_v38  ;;  %937 = vmatmul.bf16.gmra.mxu3 %v2192_v29 }
  0xdc   : > { %635 = vmatmul.bf16.gmra.mxu1 %v2155_v13 }
  0xdd   : > { %917 = vmatmul.bf16.gmra.mxu2 %v2188_v32  ;;  %1016 = vxpose.xlu0.b32.cont [6/16] %v984_v34, 128 }
  0xde   : > { %v2587_v61 = vpop.f32.mrf.mxu3 }
  0xe0   : > { %v878_v37 = vpop.f32.mrf.mxu2  ;;  %v455_v40 = vpop.f32.mrf.mxu0 }
  0xe1   : > { %v949_v39 = vadd.f32 %v878_v37, %v597_v36  ;;  %v598_v41 = vpop.f32.mrf.mxu1 }
  0xe2   : > { %v599_v44 = vadd.f32 %v598_v41, %v455_v40 }
  0xe3   : > { %v985_v42 = vadd.f32 %v2555_v52, %v949_v39 }
  0xe5   : > { %1017 = vxpose.xlu0.b32.cont [7/16] %v985_v42, 128 }
  0xe6   : > { %v2591_v7 = vpop.f32.mrf.mxu3 }
  0xe8   : > { %v880_v45 = vpop.f32.mrf.mxu2  ;;  %v458_v47 = vpop.f32.mrf.mxu0 }
  0xe9   : > { %v950_v46 = vadd.f32 %v880_v45, %v599_v44  ;;  %v601_v48 = vpop.f32.mrf.mxu1 }
  0xea   : > { %v602_v49 = vadd.f32 %v601_v48, %v458_v47 }
  0xeb   : > { %v986_v38 = vadd.f32 %v2555_v52, %v950_v46 }
  0xed   : > { %1018 = vxpose.xlu0.b32.cont [8/16] %v986_v38, 128 }
  0xee   : > { %v2594_v16 = vpop.f32.mrf.mxu3 }
  0xf0   : > { %v883_v51 = vpop.f32.mrf.mxu2  ;;  %v460_v54 = vpop.f32.mrf.mxu0 }
  0xf1   : > { %v951_v53 = vadd.f32 %v883_v51, %v602_v49  ;;  %v603_v55 = vpop.f32.mrf.mxu1 }
  0xf2   : > { %v604_v57 = vadd.f32 %v603_v55, %v460_v54 }
  0xf3   : > { %v987_v56 = vadd.f32 %v2555_v52, %v951_v53 }
  0xf5   : > { %1019 = vxpose.xlu0.b32.cont [9/16] %v987_v56, 128 }
  0xf6   : > { %v2597_v23 = vpop.f32.mrf.mxu3 }
  0xf8   : > { %v885_v58 = vpop.f32.mrf.mxu2  ;;  %v463_v60 = vpop.f32.mrf.mxu0 }
  0xf9   : > { %v952_v59 = vadd.f32 %v885_v58, %v604_v57  ;;  %v606_v62 = vpop.f32.mrf.mxu1 }
  0xfa   : > { %v607_v0 = vadd.f32 %v606_v62, %v463_v60 }
  0xfb   : > { %v988_v63 = vadd.f32 %v2555_v52, %v952_v59 }
  0xfd   : > { %1020 = vxpose.xlu0.b32.cont [10/16] %v988_v63, 128 }
  0xfe   : > { %v2600_v34 = vpop.f32.mrf.mxu3 }
 0x100   : > { %v888_v1 = vpop.f32.mrf.mxu2  ;;  %v465_v3 = vpop.f32.mrf.mxu0 }
 0x101   : > { %v953_v2 = vadd.f32 %v888_v1, %v607_v0  ;;  %v608_v5 = vpop.f32.mrf.mxu1 }
 0x102   : > { %v609_v8 = vadd.f32 %v608_v5, %v465_v3 }
 0x103   : > { %v989_v6 = vadd.f32 %v2555_v52, %v953_v2 }
 0x105   : > { %1021 = vxpose.xlu0.b32.cont [11/16] %v989_v6, 128 }
 0x106   : > { %v2604_v46 = vpop.f32.mrf.mxu3 }
 0x108   : > { %v890_v9 = vpop.f32.mrf.mxu2  ;;  %v468_v12 = vpop.f32.mrf.mxu0 }
 0x109   : > { %v954_v10 = vadd.f32 %v890_v9, %v609_v8  ;;  %v611_v13 = vpop.f32.mrf.mxu1 }
 0x10a   : > { %v612_v15 = vadd.f32 %v611_v13, %v468_v12 }
 0x10b   : > { %v990_v14 = vadd.f32 %v2555_v52, %v954_v10 }
 0x10d   : > { %1022 = vxpose.xlu0.b32.cont [12/16] %v990_v14, 128 }
 0x10e   : > { %v2607_v54 = vpop.f32.mrf.mxu3 }
 0x110   : > { %v893_v17 = vpop.f32.mrf.mxu2  ;;  %v470_v19 = vpop.f32.mrf.mxu0 }
 0x111   : > { %v955_v18 = vadd.f32 %v893_v17, %v612_v15  ;;  %v613_v20 = vpop.f32.mrf.mxu1 }
 0x112   : > { %v614_v22 = vadd.f32 %v613_v20, %v470_v19 }
 0x113   : > { %v991_v21 = vadd.f32 %v2555_v52, %v955_v18 }
 0x115   : > { %1023 = vxpose.xlu0.b32.cont [13/16] %v991_v21, 128 }
 0x116   : > { %v2610_v63 = vpop.f32.mrf.mxu3 }
 0x118   : > { %v895_v25 = vpop.f32.mrf.mxu2  ;;  %v473_v27 = vpop.f32.mrf.mxu0 }
 0x119   : > { %v956_v26 = vadd.f32 %v895_v25, %v614_v22  ;;  %v616_v28 = vpop.f32.mrf.mxu1 }
 0x11a   : > { %v617_v30 = vadd.f32 %v616_v28, %v473_v27 }
 0x11b   : > { %v992_v29 = vadd.f32 %v2555_v52, %v956_v26 }
 0x11d   : > { %1024 = vxpose.xlu0.b32.cont [14/16] %v992_v29, 128 }
 0x11e   : > { %v2613_v12 = vpop.f32.mrf.mxu3 }
 0x120   : > { %v898_v31 = vpop.f32.mrf.mxu2  ;;  %v475_v33 = vpop.f32.mrf.mxu0 }
 0x121   : > { %v957_v32 = vadd.f32 %v898_v31, %v617_v30  ;;  %v618_v36 = vpop.f32.mrf.mxu1 }
 0x122   : > { %v619_v39 = vadd.f32 %v618_v36, %v475_v33 }
 0x123   : > { %v993_v37 = vadd.f32 %v2555_v52, %v957_v32 }
 0x125   : > { %1025 = vxpose.xlu0.b32.cont [15/16] %v993_v37, 128 }
 0x126   : > { %v2617_v22 = vpop.f32.mrf.mxu3 }
 0x128   : > { %v900_v40 = vpop.f32.mrf.mxu2  ;;  %v478_v42 = vpop.f32.mrf.mxu0 }
 0x129   : > { %v958_v41 = vadd.f32 %v900_v40, %v619_v39  ;;  %v621_v44 = vpop.f32.mrf.mxu1 }
 0x12a   : > { %v622_v47 = vadd.f32 %v621_v44, %v478_v42 }
 0x12b   : > { %v994_v45 = vadd.f32 %v2555_v52, %v958_v41 }
 0x12d   : > { %1026 = vxpose.xlu0.b32.end [16/16] %v994_v45, 128 }
 0x12e   : > { %v923_v33 = vpop.f32.mrf.mxu3 }
 0x130   : > { %v903_v48 = vpop.f32.mrf.mxu2  ;;  %v480_v49 = vpop.f32.mrf.mxu0 }
 0x131   : > { %v959_v38 = vadd.f32 %v903_v48, %v622_v47  ;;  %v623_v51 = vpop.f32.mrf.mxu1 }
 0x132   : > { %v624_v55 = vadd.f32 %v623_v51, %v480_v49  ;;  %v642_v51 = vadd.f32 %v2594_v16, %v2562_v4 }
 0x133   : > { %v995_v53 = vadd.f32 %v2555_v52, %v959_v38 }
 0x135   : > { %1043 = vxpose.xlu1.b32.start [1/16] %v995_v53, 128  ;;  %v967_v53 = vadd.f32 %v923_v33, %v642_v51 }
 0x136   : > { %v925_v45 = vpop.f32.mrf.mxu3 }
 0x138   : > { %v905_v56 = vpop.f32.mrf.mxu2  ;;  %v483_v58 = vpop.f32.mrf.mxu0 }
 0x139   : > { %v960_v57 = vadd.f32 %v905_v56, %v624_v55  ;;  %v626_v59 = vpop.f32.mrf.mxu1 }
 0x13a   : > { %v627_v62 = vadd.f32 %v626_v59, %v483_v58  ;;  %v644_v58 = vadd.f32 %v2597_v23, %v2565_v11 }
 0x13b   : > { %v996_v60 = vadd.f32 %v2555_v52, %v960_v57  ;;  %v1003_v57 = vadd.f32 %v2555_v52, %v967_v53 }
 0x13c   : > { %v968_v59 = vadd.f32 %v925_v45, %v644_v58 }
 0x13d   : > { %1044 = vxpose.xlu1.b32.cont [2/16] %v996_v60, 128 }
 0x13e   : > { %v928_v55 = vpop.f32.mrf.mxu3 }
 0x140   : > { %v908_v0 = vpop.f32.mrf.mxu2  ;;  %v485_v2 = vpop.f32.mrf.mxu0 }
 0x141   : > { %v961_v1 = vadd.f32 %v908_v0, %v627_v62  ;;  %v628_v3 = vpop.f32.mrf.mxu1  ;;  %v1004_v62 = vadd.f32 %v2555_v52, %v968_v59 }
 0x142   : > { %v629_v6 = vadd.f32 %v628_v3, %v485_v2  ;;  %v649_v3 = vadd.f32 %v2604_v46, %v2577_v35  ;;  %v654_v35 = vadd.f32 %v2610_v63, %v2584_v50 }
 0x143   : > { %v997_v5 = vadd.f32 %v2555_v52, %v961_v1  ;;  %v647_v1 = vadd.f32 %v2600_v34, %v2571_v24 }
 0x145   : > { %1045 = vxpose.xlu1.b32.cont [3/16] %v997_v5, 128  ;;  %v969_v4 = vadd.f32 %v928_v55, %v647_v1 }
 0x146   : > { %v930_v0 = vpop.f32.mrf.mxu3 }
 0x147   : > { %v1005_v2 = vadd.f32 %v2555_v52, %v969_v4  ;;  %v970_v11 = vadd.f32 %v930_v0, %v649_v3 }
 0x148   : > { %v910_v8 = vpop.f32.mrf.mxu2  ;;  %v488_v10 = vpop.f32.mrf.mxu0 }
 0x149   : > { %v962_v9 = vadd.f32 %v910_v8, %v629_v6  ;;  %v631_v13 = vpop.f32.mrf.mxu1  ;;  %v1006_v6 = vadd.f32 %v2555_v52, %v970_v11  ;;  %v652_v8 = vadd.f32 %v2607_v54, %v2581_v43 }
 0x14a   : > { %v632_v15 = vadd.f32 %v631_v13, %v488_v10 }
 0x14b   : > { %v998_v14 = vadd.f32 %v2555_v52, %v962_v9 }
 0x14d   : > { %1046 = vxpose.xlu1.b32.cont [4/16] %v998_v14, 128 }
 0x14e   : > { %v933_v5 = vpop.f32.mrf.mxu3 }
 0x14f   : > { %v971_v9 = vadd.f32 %v933_v5, %v652_v8 }
 0x150   : > { %v913_v17 = vpop.f32.mrf.mxu2  ;;  %v490_v19 = vpop.f32.mrf.mxu0 }
 0x151   : > { %v963_v18 = vadd.f32 %v913_v17, %v632_v15  ;;  %v633_v20 = vpop.f32.mrf.mxu1  ;;  %v1007_v13 = vadd.f32 %v2555_v52, %v971_v9 }
 0x152   : > { %v634_v25 = vadd.f32 %v633_v20, %v490_v19  ;;  %v657_v19 = vadd.f32 %v2613_v12, %v2587_v61  ;;  %v659_v61 = vadd.f32 %v2617_v22, %v2591_v7 }
 0x153   : > { %v999_v21 = vadd.f32 %v2555_v52, %v963_v18 }
 0x155   : > { %1047 = vxpose.xlu1.b32.cont [5/16] %v999_v21, 128 }
 0x156   : > { %v935_v24 = vpop.f32.mrf.mxu3 }
 0x157   : > { %v972_v46 = vadd.f32 %v935_v24, %v654_v35 }
 0x158   : > { %v915_v26 = vpop.f32.mrf.mxu2  ;;  %v493_v28 = vpop.f32.mrf.mxu0 }
 0x159   : > { %v964_v27 = vadd.f32 %v915_v26, %v634_v25  ;;  %v636_v29 = vpop.f32.mrf.mxu1  ;;  %v1027_v30 = vpop.trf.xlu0  ;;  %v1008_v43 = vadd.f32 %v2555_v52, %v972_v46 }
 0x15a   : > { %v637_v32 = vadd.f32 %v636_v29, %v493_v28  ;;  %v2100_v34 = vmul.f32 -1.442695, %v1027_v30 }
 0x15b   : > { %v1000_v31 = vadd.f32 %v2555_v52, %v964_v27 }
 0x15c   : > { %2235 = vpow2.f32 %v2100_v34 }
 0x15d   : > { %1048 = vxpose.xlu1.b32.cont [6/16] %v1000_v31, 128 }
 0x15e   : > { %v938_v15 = vpop.f32.mrf.mxu3 }
 0x15f   : > { %v973_v20 = vadd.f32 %v938_v15, %v657_v19 }
 0x160   : > { %v918_v36 = vpop.f32.mrf.mxu2  ;;  %v495_v41 = vpop.f32.mrf.mxu0 }
 0x161   : > { %v965_v37 = vadd.f32 %v918_v36, %v637_v32  ;;  %v1028_v39 = vpop.trf.xlu0  ;;  %v638_v42 = vpop.f32.mrf.mxu1  ;;  %v1009_v27 = vadd.f32 %v2555_v52, %v973_v20 }
 0x162   : > { %v639_v44 = vadd.f32 %v638_v42, %v495_v41  ;;  %v2102_v14 = vmul.f32 -1.442695, %v1028_v39  ;;  %v2236_v54 = vpop.eup %2235 }
 0x163   : > { %v1001_v40 = vadd.f32 %v2555_v52, %v965_v37  ;;  %v2644_v21 = vadd.f32 1.0, %v2236_v54 }
 0x164   : > { %2237 = vpow2.f32 %v2102_v14 }
 0x165   : > { %1049 = vxpose.xlu1.b32.cont [7/16] %v1001_v40, 128  ;;  %vm1208_vm0 = vweird.f32 %v2644_v21  ;;  %v1214_v0 = vand.u32 2147483648, %v2644_v21 }
 0x166   : > { %v940_v28 = vpop.f32.mrf.mxu3 }
 0x167   : > { %v974_v31 = vadd.f32 %v940_v28, %v659_v61 }
 0x168   : > { %v920_v47 = vpop.f32.mrf.mxu2 }
 0x169   : > { %v966_v48 = vadd.f32 %v920_v47, %v639_v44  ;;  %v1029_v38 = vpop.trf.xlu0  ;;  %v1010_v40 = vadd.f32 %v2555_v52, %v974_v31 }
 0x16a   : > { %v2104_v18 = vmul.f32 -1.442695, %v1029_v38  ;;  %v2238_v50 = vpop.eup %2237 }
 0x16b   : > { %v1002_v49 = vadd.f32 %v2555_v52, %v966_v48  ;;  %v2650_v29 = vadd.f32 1.0, %v2238_v50 }
 0x16c   : > { %2239 = vpow2.f32 %v2104_v18 }
 0x16d   : > { %1050 = vxpose.xlu1.b32.cont [8/16] %v1002_v49, 128  ;;  %2241 = vrcp.f32 %v2644_v21  ;;  %vm1238_vm3 = vweird.f32 %v2650_v29  ;;  %v1242_v3 = vand.u32 2147483647, %v2650_v29  ;;  %v1244_v5 = vand.u32 2147483648, %v2650_v29 }
 0x16f   : > { %vm2728_vm7 = vcmp.eq.f32.partialorder %v1242_v3, 8.507059e+37  ;;  %v1245_v18 = vor.u32 1.1754944e-38, %v1244_v5 }
 0x171   : > { %v1030_v56 = vpop.trf.xlu0 }
 0x172   : > { %v2106_v12 = vmul.f32 -1.442695, %v1030_v56  ;;  %v2240_v30 = vpop.eup %2239 }
 0x173   : > { %v2655_v33 = vpop.eup %2241  ;;  %v2657_v36 = vadd.f32 1.0, %v2240_v30 }
 0x174   : > { %v1204_v7 = vmul.f32 %v2655_v33, %v2644_v21  ;;  %vm1209_vm1 = vweird.f32 %v2655_v33 }
 0x175   : > { %1051 = vxpose.xlu1.b32.cont [9/16] %v1003_v57, 128  ;;  %vm2695_vm2 = vmor %vm1208_vm0, %vm1209_vm1  ;;  %v1274_v46 = vand.u32 2147483648, %v2657_v36  ;;  %vm1268_vm8 = vweird.f32 %v2657_v36 }
 0x176   : > { %v1205_v45 = vsub.f32 1.0, %v1204_v7 }
 0x178   : > { %v1206_v55 = vmul.f32 %v2655_v33, %v1205_v45 }
 0x179   : > { %v1031_v60 = vpop.trf.xlu0 }
 0x17a   : > { %v2108_v63 = vmul.f32 -1.442695, %v1031_v60  ;;  %v1207_v60 = vadd.f32 %v2655_v33, %v1206_v55 }
 0x17c   : > { %2243 = vpow2.f32 %v2108_v63  ;;  %v1211_v34 = vsel %vm2695_vm2, %v2655_v33, %v1207_v60 }
 0x17d   : > { %1052 = vxpose.xlu1.b32.cont [10/16] %v1004_v62, 128  ;;  %v1212_v62 = vand.u32 2147483647, %v2644_v21 }
 0x17f   : > { %vm1213_vm5 = vcmp.eq.f32.partialorder %v1212_v62, 8.507059e+37 }
 0x181   : > { %v1032_v16 = vpop.trf.xlu0 }
 0x182   : > { %v2110_v26 = vmul.f32 -1.442695, %v1032_v16  ;;  %v2244_v39 = vpop.eup %2243 }
 0x183   : > { %v2667_v42 = vadd.f32 1.0, %v2244_v39 }
 0x184   : > { %2245 = vpow2.f32 %v2110_v26  ;;  %v2743_v26 = vor.u32 1.1754944e-38, %v1274_v46 }
 0x185   : > { %1053 = vxpose.xlu1.b32.cont [11/16] %v1005_v2, 128  ;;  %2247 = vrcp.f32 %v2650_v29  ;;  %vm1328_vm10 = vweird.f32 %v2667_v42  ;;  %v1334_v7 = vand.u32 2147483648, %v2667_v42 }
 0x186   : > { %2249 = vpow2.f32 %v2106_v12 }
 0x187   : > { %v1335_v5 = vor.u32 1.1754944e-38, %v1334_v7 }
 0x189   : > { %v1033_v23 = vpop.trf.xlu0 }
 0x18a   : > { %v2112_v32 = vmul.f32 -1.442695, %v1033_v23  ;;  %v2246_v22 = vpop.eup %2245 }
 0x18b   : > { %v2665_v41 = vpop.eup %2247  ;;  %v2669_v47 = vadd.f32 1.0, %v2246_v22 }
 0x18c   : > { %2251 = vpow2.f32 %v2112_v32  ;;  %v2250_v44 = vpop.eup %2249  ;;  %v1234_v48 = vmul.f32 %v2665_v41, %v2650_v29  ;;  %vm1239_vm4 = vweird.f32 %v2665_v41  ;;  %v1332_v32 = vand.u32 2147483647, %v2667_v42 }
 0x18d   : > { %1054 = vxpose.xlu1.b32.cont [12/16] %v1006_v6, 128  ;;  %2253 = vrcp.f32 %v2657_v36  ;;  %v2673_v38 = vadd.f32 1.0, %v2250_v44  ;;  %vm2721_vm6 = vmor %vm1238_vm3, %vm1239_vm4  ;;  %vm1358_vm14 = vweird.f32 %v2669_v47 }
 0x18e   : > { %2255 = vrcp.f32 %v2667_v42  ;;  %v1235_v56 = vsub.f32 1.0, %v1234_v48  ;;  %vm2801_vm1 = vcmp.eq.f32.partialorder %v1332_v32, 8.507059e+37 }
 0x18f   : > { %2257 = vrcp.f32 %v2669_v47  ;;  %v1304_v60 = vand.u32 2147483648, %v2673_v38 }
 0x190   : > { %2259 = vrcp.f32 %v2673_v38  ;;  %v1236_v16 = vmul.f32 %v2665_v41, %v1235_v56  ;;  %v1364_v56 = vand.u32 2147483648, %v2669_v47 }
 0x191   : > { %v2636_v10 = vpop.trf.xlu0 }
 0x192   : > { %v2252_v52 = vpop.eup %2251  ;;  %v2114_v1 = vmul.f32 -1.442695, %v2636_v10  ;;  %v1215_v10 = vor.u32 1.1754944e-38, %v1214_v0  ;;  %v1237_v35 = vadd.f32 %v2665_v41, %v1236_v16 }
 0x193   : > { %v2678_v51 = vpop.eup %2253  ;;  %v2682_v57 = vadd.f32 1.0, %v2252_v52  ;;  %v1362_v52 = vand.u32 2147483647, %v2669_v47 }
 0x194   : > { %v1264_v58 = vmul.f32 %v2678_v51, %v2657_v36  ;;  %v2689_v59 = vpop.eup %2255  ;;  %v2732_v20 = vsel %vm1213_vm5, %v1215_v10, %v1211_v34  ;;  %v1241_v63 = vsel %vm2721_vm6, %v2665_v41, %v1237_v35  ;;  %vm1269_vm9 = vweird.f32 %v2678_v51 }
 0x195   : > { %1055 = vxpose.xlu1.b32.cont [13/16] %v1007_v13, 128  ;;  %v2701_v2 = vpop.eup %2257  ;;  %v1324_v6 = vmul.f32 %v2689_v59, %v2667_v42  ;;  %vm1329_vm12 = vweird.f32 %v2689_v59  ;;  %vm2771_vm13 = vmor %vm1268_vm8, %vm1269_vm9  ;;  %vm2818_vm3 = vcmp.eq.f32.partialorder %v1362_v52, 8.507059e+37  ;;  %v1365_v34 = vor.u32 1.1754944e-38, %v1364_v56 }
 0x196   : > { %v1265_v11 = vsub.f32 1.0, %v1264_v58  ;;  %v2710_v24 = vpop.eup %2259  ;;  %v1354_v14 = vmul.f32 %v2701_v2, %v2669_v47  ;;  %vm1359_vm15 = vweird.f32 %v2701_v2  ;;  %v1302_v58 = vand.u32 2147483647, %v2673_v38  ;;  %vm2791_vm0 = vmor %vm1328_vm10, %vm1329_vm12 }
 0x197   : > { %v1325_v19 = vsub.f32 1.0, %v1324_v6  ;;  %v1294_v21 = vmul.f32 %v2710_v24, %v2673_v38  ;;  %vm2814_vm2 = vmor %vm1358_vm14, %vm1359_vm15  ;;  %vm1388_vm4 = vweird.f32 %v2682_v57 }
 0x199   : > { %v1035_v17 = vpop.trf.xlu0  ;;  %v1326_v31 = vmul.f32 %v2689_v59, %v1325_v19 }
 0x19a   : > { %v2116_v53 = vmul.f32 -1.442695, %v1035_v17  ;;  %v1266_v17 = vmul.f32 %v2678_v51, %v1265_v11 }
 0x19b   : > { %v1327_v55 = vadd.f32 %v2689_v59, %v1326_v31 }
 0x19c   : > { %2261 = vpow2.f32 %v2116_v53  ;;  %v2746_v29 = vadd.f32 %v2678_v51, %v1266_v17 }
 0x19d   : > { %1056 = vxpose.xlu1.b32.cont [14/16] %v1008_v43, 128  ;;  %2263 = vrcp.f32 %v2682_v57 }
 0x19e   : > { %2265 = vpow2.f32 %v2114_v1  ;;  %v1271_v1 = vsel %vm2771_vm13, %v2678_v51, %v2746_v29 }
 0x1a1   : > { %v2646_v25 = vpop.trf.xlu0 }
 0x1a2   : > { %v2118_v8 = vmul.f32 -1.442695, %v2646_v25  ;;  %v2262_v13 = vpop.eup %2261  ;;  %v1272_v25 = vand.u32 2147483647, %v2657_v36  ;;  %v2783_v36 = vsel %vm2728_vm7, %v1245_v18, %v1241_v63 }
 0x1a3   : > { %v2726_v43 = vpop.eup %2263  ;;  %v2737_v50 = vadd.f32 1.0, %v2262_v13  ;;  %v1392_v13 = vand.u32 2147483647, %v2682_v57 }
 0x1a4   : > { %v2266_v28 = vpop.eup %2265  ;;  %v1384_v61 = vmul.f32 %v2726_v43, %v2682_v57  ;;  %vm2759_vm11 = vcmp.eq.f32.partialorder %v1272_v25, 8.507059e+37  ;;  %vm1389_vm5 = vweird.f32 %v2726_v43 }
 0x1a5   : > { %1057 = vxpose.xlu1.b32.cont [15/16] %v1009_v27, 128  ;;  %v1355_v27 = vsub.f32 1.0, %v1354_v14  ;;  %v2765_v48 = vadd.f32 1.0, %v2266_v28  ;;  %vm2848_vm6 = vmor %vm1388_vm4, %vm1389_vm5  ;;  %v2857_v63 = vsel %vm2759_vm11, %v2743_v26, %v1271_v1  ;;  %vm2868_vm9 = vcmp.eq.f32.partialorder %v1392_v13, 8.507059e+37 }
 0x1a6   : > { %v1385_v53 = vsub.f32 1.0, %v1384_v61  ;;  %vm1448_vm14 = vweird.f32 %v2737_v50 }
 0x1a7   : > { %v1356_v45 = vmul.f32 %v2701_v2, %v1355_v27  ;;  %vm1418_vm5 = vweird.f32 %v2765_v48 }
 0x1a9   : > { %v2659_v37 = vpop.trf.xlu0  ;;  %v1357_v16 = vadd.f32 %v2701_v2, %v1356_v45 }
 0x1aa   : > { %v2120_v33 = vmul.f32 -1.442695, %v2659_v37  ;;  %v1452_v37 = vand.u32 2147483647, %v2737_v50 }
 0x1ab   : > { %v1361_v14 = vsel %vm2814_vm2, %v2701_v2, %v1357_v16 }
 0x1ac   : > { %v1366_v26 = vsel %vm2818_vm3, %v1365_v34, %v1361_v14 }
 0x1ad   : > { %1058 = vxpose.xlu1.b32.end [16/16] %v1010_v40, 128  ;;  %v1295_v40 = vsub.f32 1.0, %v1294_v21 }
 0x1af   : > { %v1296_v3 = vmul.f32 %v2710_v24, %v1295_v40 }
 0x1b1   : > { %v2676_v49 = vpop.trf.xlu0  ;;  %v2860_v25 = vadd.f32 %v2710_v24, %v1296_v3 }
 0x1b2   : > { %v2122_v54 = vmul.f32 -1.442695, %v2676_v49 }
 0x1b9   : > { %v1039_v23 = vpop.trf.xlu0 }
 0x1ba   : > { %v2124_v9 = vmul.f32 -1.442695, %v1039_v23  ;;  %v1386_v23 = vmul.f32 %v2726_v43, %v1385_v53  ;;  %v1701_v53 = vld [vmem:[%s2877_s26 + $0x10] sm:$0xff] }
 0x1bb   : > { %v2909_v51 = vmul.f32 %v1701_v53, %v1366_v26 }
 0x1bc   : > { %2267 = vpow2.f32 %v2124_v9  ;;  %v1331_v9 = vsel %vm2791_vm0, %v2689_v59, %v1327_v55  ;;  %v1394_v59 = vand.u32 2147483648, %v2682_v57  ;;  %v1387_v17 = vadd.f32 %v2726_v43, %v1386_v23 }
 0x1bd   : > { %2269 = vpow2.f32 %v2118_v8  ;;  %v1336_v28 = vsel %vm2801_vm1, %v1335_v5, %v1331_v9  ;;  %v1454_v55 = vand.u32 2147483648, %v2737_v50  ;;  %vm2926_vm0 = vcmp.eq.f32.partialorder %v1452_v37, 8.507059e+37  ;;  %v1703_v37 = vld [vmem:[%s2877_s26 + $0x20] sm:$0xff] }
 0x1be   : > { %2271 = vrcp.f32 %v2737_v50  ;;  %v1395_v61 = vor.u32 1.1754944e-38, %v1394_v59  ;;  %v1391_v31 = vsel %vm2848_vm6, %v2726_v43, %v1387_v17 }
 0x1c0   : > { %v2916_v9 = vsel %vm2868_vm9, %v1395_v61, %v1391_v31 }
 0x1c1   : > { %v1040_v12 = vpop.trf.xlu0 }
 0x1c2   : > { %v2268_v30 = vpop.eup %2267  ;;  %v2126_v39 = vmul.f32 -1.442695, %v1040_v12 }
 0x1c3   : > { %v2757_v22 = vadd.f32 1.0, %v2268_v30  ;;  %v2270_v41 = vpop.eup %2269 }
 0x1c4   : > { %2273 = vpow2.f32 %v2126_v39  ;;  %v2795_v0 = vadd.f32 1.0, %v2270_v41  ;;  %v2807_v42 = vpop.eup %2271 }
 0x1c5   : > { %2275 = vrcp.f32 %v2757_v22  ;;  %v1574_v18 = vand.u32 2147483648, %v2757_v22  ;;  %vm1568_vm7 = vweird.f32 %v2757_v22  ;;  %v1572_v49 = vand.u32 2147483647, %v2757_v22 }
 0x1c6   : > { %2277 = vpow2.f32 %v2120_v33  ;;  %v1444_v57 = vmul.f32 %v2807_v42, %v2737_v50  ;;  %vm1449_vm15 = vweird.f32 %v2807_v42  ;;  %vm1478_vm9 = vweird.f32 %v2795_v0 }
 0x1c7   : > { %2279 = vrcp.f32 %v2765_v48  ;;  %v1575_v39 = vor.u32 1.1754944e-38, %v1574_v18  ;;  %vm1573_vm11 = vcmp.eq.f32.partialorder %v1572_v49, 8.507059e+37  ;;  %vm2952_vm3 = vmor %vm1448_vm14, %vm1449_vm15 }
 0x1c8   : > { %2281 = vrcp.f32 %v2795_v0  ;;  %v1445_v45 = vsub.f32 1.0, %v1444_v57 }
 0x1c9   : > { %v1041_v6 = vpop.trf.xlu0 }
 0x1ca   : > { %v2274_v8 = vpop.eup %2273  ;;  %v2128_v47 = vmul.f32 -1.442695, %v1041_v6  ;;  %v1446_v23 = vmul.f32 %v2807_v42, %v1445_v45 }
 0x1cb   : > { %v2276_v10 = vpop.eup %2275  ;;  %v2830_v35 = vadd.f32 1.0, %v2274_v8 }
 0x1cc   : > { %v2278_v46 = vpop.eup %2277  ;;  %v1564_v15 = vmul.f32 %v2276_v10, %v2757_v22  ;;  %2283 = vpow2.f32 %v2128_v47  ;;  %vm1569_vm8 = vweird.f32 %v2276_v10  ;;  %v1699_v22 = vld [vmem:[%s2877_s26] sm:$0xff]  ;;  %v1447_v49 = vadd.f32 %v2807_v42, %v1446_v23 }
 0x1cd   : > { %2285 = vrcp.f32 %v2830_v35  ;;  %v2841_v19 = vpop.eup %2279  ;;  %v2864_v27 = vadd.f32 1.0, %v2278_v46  ;;  %vm2891_vm10 = vmor %vm1568_vm7, %vm1569_vm8  ;;  %vm1598_vm12 = vweird.f32 %v2830_v35  ;;  %v1604_v4 = vand.u32 2147483648, %v2830_v35 }
 0x1ce   : > { %v1565_v21 = vsub.f32 1.0, %v1564_v15  ;;  %v2872_v30 = vpop.eup %2281  ;;  %v2886_v32 = vmul.f32 %v2841_v19, %v2765_v48  ;;  %2287 = vpow2.f32 %v2122_v54  ;;  %v1602_v5 = vand.u32 2147483647, %v2830_v35 }
 0x1cf   : > { %2289 = vrcp.f32 %v2864_v27  ;;  %v1707_v11 = vmul.f32 %v1699_v22, %v1336_v28  ;;  %v1474_v6 = vmul.f32 %v2872_v30, %v2795_v0  ;;  %v1605_v15 = vor.u32 1.1754944e-38, %v1604_v4 }
 0x1d0   : > { %v1566_v12 = vmul.f32 %v2276_v10, %v1565_v21  ;;  %v1415_v46 = vsub.f32 1.0, %v2886_v32  ;;  %v1455_v54 = vor.u32 1.1754944e-38, %v1454_v55  ;;  %vm1603_vm2 = vcmp.eq.f32.partialorder %v1602_v5, 8.507059e+37 }
 0x1d1   : > { %v1042_v40 = vpop.trf.xlu0  ;;  %v1475_v57 = vsub.f32 1.0, %v1474_v6  ;;  %vm1298_vm7 = vweird.f32 %v2673_v38  ;;  %vm1299_vm8 = vweird.f32 %v2710_v24  ;;  %v1482_v22 = vand.u32 2147483647, %v2795_v0 }
 0x1d2   : > { %v2284_v7 = vpop.eup %2283  ;;  %v1567_v41 = vadd.f32 %v2276_v10, %v1566_v12  ;;  %v2130_v44 = vmul.f32 -1.442695, %v1042_v40  ;;  %v1451_v40 = vsel %vm2952_vm3, %v2807_v42, %v1447_v49  ;;  %v1484_v42 = vand.u32 2147483648, %v2795_v0 }
 0x1d3   : > { %v2286_v43 = vpop.eup %2285  ;;  %v2897_v52 = vadd.f32 1.0, %v2284_v7  ;;  %v1476_v7 = vmul.f32 %v2872_v30, %v1475_v57  ;;  %v1711_v23 = vmul.f32 %v1703_v37, %v2916_v9  ;;  %vm3011_vm15 = vcmp.eq.f32.partialorder %v1482_v22, 8.507059e+37 }
 0x1d4   : > { %v1571_v56 = vsel %vm2891_vm10, %v2276_v10, %v1567_v41  ;;  %v1594_v62 = vmul.f32 %v2286_v43, %v2830_v35  ;;  %2291 = vpow2.f32 %v2130_v44  ;;  %vm1599_vm13 = vweird.f32 %v2286_v43  ;;  %v2288_v8 = vpop.eup %2287 }
 0x1d5   : > { %v1576_v1 = vsel %vm1573_vm11, %v1575_v39, %v1571_v56  ;;  %2293 = vrcp.f32 %v2897_v52  ;;  %v2922_v13 = vpop.eup %2289  ;;  %vm2933_vm1 = vmor %vm1598_vm12, %vm1599_vm13  ;;  %v2939_v28 = vadd.f32 1.0, %v2288_v8  ;;  %vm1628_vm4 = vweird.f32 %v2897_v52 }
 0x1d6   : > { %v1683_v16 = vmul.f32 2.0, %v1576_v1  ;;  %v1595_v3 = vsub.f32 1.0, %v1594_v62  ;;  %v1632_v31 = vand.u32 2147483647, %v2897_v52  ;;  %v1634_v32 = vand.u32 2147483648, %v2897_v52 }
 0x1d7   : > { %v1416_v39 = vmul.f32 %v2841_v19, %v1415_v46  ;;  %v1504_v41 = vmul.f32 %v2922_v13, %v2864_v27  ;;  %vm1479_vm10 = vweird.f32 %v2872_v30  ;;  %v1456_v56 = vsel %vm2926_vm0, %v1455_v54, %v1451_v40 }
 0x1d8   : > { %v2132_v34 = vadd.f32 -1.0, %v1683_v16  ;;  %v1596_v47 = vmul.f32 %v2286_v43, %v1595_v3  ;;  %v1635_v55 = vor.u32 1.1754944e-38, %v1634_v32  ;;  %vm1633_vm12 = vcmp.eq.f32.partialorder %v1632_v31, 8.507059e+37  ;;  %vm3003_vm14 = vmor %vm1478_vm9, %vm1479_vm10 }
 0x1d9   : > { %v2920_v10 = vpop.trf.xlu1  ;;  %v1422_v16 = vand.u32 2147483647, %v2765_v48  ;;  %v1424_v3 = vand.u32 2147483648, %v2765_v48  ;;  %v1505_v5 = vsub.f32 1.0, %v1504_v41  ;;  %vm1419_vm13 = vweird.f32 %v2841_v19  ;;  %vm3051_vm9 = vmor %vm1298_vm7, %vm1299_vm8 }
 0x1da   : > { %v2292_v17 = vpop.eup %2291  ;;  %v1715_v18 = vmul.f32 %v2132_v34, %v2732_v20  ;;  %v1597_v2 = vadd.f32 %v2286_v43, %v1596_v47  ;;  %v1417_v34 = vadd.f32 %v2841_v19, %v1416_v39  ;;  %v1485_v0 = vor.u32 1.1754944e-38, %v1484_v42  ;;  %v1705_v42 = vld [vmem:[%s2877_s26 + $0x30] sm:$0xff] }
 0x1db   : > { %v2294_v21 = vpop.eup %2293  ;;  %v2946_v35 = vadd.f32 1.0, %v2292_v17  ;;  %v1506_v17 = vmul.f32 %v2922_v13, %v1505_v5  ;;  %vm3039_vm3 = vcmp.eq.f32.partialorder %v1422_v16, 8.507059e+37  ;;  %v1425_v31 = vor.u32 1.1754944e-38, %v1424_v3 }
 0x1dc   : > { %v1723_v29 = vadd.f32 %v1715_v18, %v1707_v11  ;;  %v1601_v61 = vsel %vm2933_vm1, %v2286_v43, %v1597_v2  ;;  %v1624_v12 = vmul.f32 %v2294_v21, %v2897_v52  ;;  %vm1629_vm6 = vweird.f32 %v2294_v21 }
 0x1dd   : > { %v1606_v26 = vsel %vm1603_vm2, %v1605_v15, %v1601_v61  ;;  %2295 = vrcp.f32 %v2946_v35  ;;  %vm2985_vm11 = vmor %vm1628_vm4, %vm1629_vm6  ;;  %v1477_v52 = vadd.f32 %v2872_v30, %v1476_v7  ;;  %vm1658_vm0 = vweird.f32 %v2946_v35 }
 0x1de   : > { %2297 = vtanh.f32 %v1723_v29  ;;  %1755 = vst [vmem:[%s2944_s29 + $0x40] sm:$0xff] %v1723_v29  ;;  %v1685_v50 = vmul.f32 2.0, %v1606_v26  ;;  %v1625_v33 = vsub.f32 1.0, %v1624_v12  ;;  %v1664_v54 = vand.u32 2147483648, %v2946_v35  ;;  %vm3035_vm2 = vmor %vm1418_vm5, %vm1419_vm13 }
 0x1df   : > { %2299 = vrcp.f32 %v2939_v28  ;;  %v1481_v15 = vsel %vm3003_vm14, %v2872_v30, %v1477_v52  ;;  %vm1508_vm4 = vweird.f32 %v2864_v27  ;;  %vm1509_vm6 = vweird.f32 %v2922_v13 }
 0x1e0   : > { %v2134_v44 = vadd.f32 -1.0, %v1685_v50  ;;  %v1626_v43 = vmul.f32 %v2294_v21, %v1625_v33  ;;  %v1486_v29 = vsel %vm3011_vm15, %v1485_v0, %v1481_v15  ;;  %v1514_v61 = vand.u32 2147483648, %v2864_v27  ;;  %vm3075_vm7 = vmor %vm1508_vm4, %vm1509_vm6 }
 0x1e1   : > { %v2976_v45 = vpop.trf.xlu1  ;;  %v1507_v32 = vadd.f32 %v2922_v13, %v1506_v17  ;;  %v1512_v50 = vand.u32 2147483647, %v2864_v27  ;;  %v1665_v39 = vor.u32 1.1754944e-38, %v1664_v54  ;;  %vm3082_vm10 = vcmp.eq.f32.partialorder %v1302_v58, 8.507059e+37 }
 0x1e2   : > { %v1717_v62 = vmul.f32 %v2134_v44, %v2783_v36  ;;  %v1627_v1 = vadd.f32 %v2294_v21, %v1626_v43  ;;  %v1301_v37 = vsel %vm3051_vm9, %v2710_v24, %v2860_v25  ;;  %v1515_v22 = vor.u32 1.1754944e-38, %v1514_v61 }
 0x1e3   : > { %v2992_v4 = vpop.eup %2295  ;;  %v1511_v38 = vsel %vm3075_vm7, %v2922_v13, %v1507_v32  ;;  %v1544_v16 = vand.u32 2147483648, %v2939_v28  ;;  %v1542_v5 = vand.u32 2147483647, %v2939_v28 }
 0x1e4   : > { %v2298_v11 = vpop.eup %2297  ;;  %v1725_v6 = vadd.f32 %v1717_v62, %v2909_v51  ;;  %v1631_v8 = vsel %vm2985_vm11, %v2294_v21, %v1627_v1  ;;  %v1654_v51 = vmul.f32 %v2992_v4, %v2946_v35  ;;  %vm1659_vm1 = vweird.f32 %v2992_v4 }
 0x1e5   : > { %v1739_v47 = vmul.f32 %v2298_v11, %v1456_v56  ;;  %v1636_v46 = vsel %vm1633_vm12, %v1635_v55, %v1631_v8  ;;  %v3015_v14 = vpop.eup %2299  ;;  %v1662_v21 = vand.u32 2147483647, %v2946_v35  ;;  %vm3066_vm5 = vmor %vm1658_vm0, %vm1659_vm1  ;;  %vm1513_vm11 = vcmp.eq.f32.partialorder %v1512_v50, 8.507059e+37 }
 0x1e6   : > { %2301 = vtanh.f32 %v1725_v6  ;;  %1757 = vst [vmem:[%s2944_s29 + $0x50] sm:$0xff] %v1725_v6  ;;  %v1687_v59 = vmul.f32 2.0, %v1636_v46  ;;  %v1655_v2 = vsub.f32 1.0, %v1654_v51  ;;  %v1534_v20 = vmul.f32 %v3015_v14, %v2939_v28 }
 0x1e7   : > { %1747 = vst [vmem:[%s2944_s29] sm:$0xff] %v1739_v47  ;;  %vm1663_vm8 = vcmp.eq.f32.partialorder %v1662_v21, 8.507059e+37  ;;  %v1516_v1 = vsel %vm1513_vm11, %v1515_v22, %v1511_v38  ;;  %vm1538_vm12 = vweird.f32 %v2939_v28  ;;  %vm1539_vm13 = vweird.f32 %v3015_v14 }
 0x1e8   : > { %v2136_v18 = vadd.f32 -1.0, %v1687_v59  ;;  %v1656_v26 = vmul.f32 %v2992_v4, %v1655_v2  ;;  %v1535_v43 = vsub.f32 1.0, %v1534_v20  ;;  %vm1540_vm14 = vmor %vm1538_vm12, %vm1539_vm13  ;;  %v1545_v36 = vor.u32 1.1754944e-38, %v1544_v16 }
 0x1e9   : > { %v3029_v49 = vpop.trf.xlu1  ;;  %vm1543_vm15 = vcmp.eq.f32.partialorder %v1542_v5, 8.507059e+37  ;;  %v2101_v59 = vmul.f32 -1.442695, %v2920_v10  ;;  %v2103_v51 = vmul.f32 -1.442695, %v2976_v45 }
 0x1ea   : > { %v1719_v12 = vmul.f32 %v2136_v18, %v2857_v63  ;;  %v1421_v63 = vsel %vm3035_vm2, %v2841_v19, %v1417_v34  ;;  %v1657_v35 = vadd.f32 %v2992_v4, %v1656_v26  ;;  %v1305_v19 = vor.u32 1.1754944e-38, %v1304_v60 }
 0x1eb   : > { %v1426_v53 = vsel %vm3039_vm3, %v1425_v31, %v1421_v63  ;;  %v1536_v56 = vmul.f32 %v3015_v14, %v1535_v43  ;;  %v2105_v15 = vmul.f32 -1.442695, %v3029_v49 }
 0x1ec   : > { %v2302_v40 = vpop.eup %2301  ;;  %v1727_v41 = vadd.f32 %v1719_v12, %v1711_v23  ;;  %v1661_v58 = vsel %vm3066_vm5, %v2992_v4, %v1657_v35  ;;  %v1306_v25 = vsel %vm3082_vm10, %v1305_v19, %v1301_v37  ;;  %v1713_v62 = vmul.f32 %v1705_v42, %v1426_v53 }
 0x1ed   : > { %v1741_v27 = vmul.f32 %v2302_v40, %v1486_v29  ;;  %v1666_v60 = vsel %vm1663_vm8, %v1665_v39, %v1661_v58  ;;  %v1537_v52 = vadd.f32 %v3015_v14, %v1536_v56 }
 0x1ee   : > { %2303 = vtanh.f32 %v1727_v41  ;;  %1759 = vst [vmem:[%s2944_s29 + $0x60] sm:$0xff] %v1727_v41  ;;  %v1689_v55 = vmul.f32 2.0, %v1666_v60 }
 0x1ef   : > { %1749 = vst [vmem:[%s2944_s29 + $0x10] sm:$0xff] %v1741_v27  ;;  %v1541_v8 = vsel %vm1540_vm14, %v3015_v14, %v1537_v52 }
 0x1f0   : > { %v2138_v4 = vadd.f32 -1.0, %v1689_v55  ;;  %v1546_v34 = vsel %vm1543_vm15, %v1545_v36, %v1541_v8 }
 0x1f1   : > { %v1062_v24 = vpop.trf.xlu1 }
 0x1f2   : > { %v1721_v3 = vmul.f32 %v2138_v4, %v1306_v25  ;;  %v2107_v18 = vmul.f32 -1.442695, %v1062_v24 }
 0x1f4   : > { %v2304_v13 = vpop.eup %2303  ;;  %v1729_v23 = vadd.f32 %v1721_v3, %v1713_v62 }
 0x1f5   : > { %v1743_v11 = vmul.f32 %v2304_v13, %v1516_v1 }
 0x1f6   : > { %2305 = vtanh.f32 %v1729_v23  ;;  %1761 = vst [vmem:[%s2944_s29 + $0x70] sm:$0xff] %v1729_v23 }
 0x1f7   : > { %1751 = vst [vmem:[%s2944_s29 + $0x20] sm:$0xff] %v1743_v11  ;;  %2307 = vpow2.f32 %v2101_v59 }
 0x1f8   : > { %2309 = vpow2.f32 %v2103_v51 }
 0x1f9   : > { %v1063_v6 = vpop.trf.xlu1  ;;  %2311 = vpow2.f32 %v2105_v15 }
 0x1fa   : > { %v2109_v2 = vmul.f32 -1.442695, %v1063_v6 }
 0x1fc   : > { %v2306_v9 = vpop.eup %2305 }
 0x1fd   : > { %v1745_v47 = vmul.f32 %v2306_v9, %v1546_v34  ;;  %v2308_v54 = vpop.eup %2307 }
 0x1fe   : > { %v1172_v14 = vadd.f32 1.0, %v2308_v54  ;;  %v2310_v30 = vpop.eup %2309 }
 0x1ff   : > { %1753 = vst [vmem:[%s2944_s29 + $0x30] sm:$0xff] %v1745_v47  ;;  %v2312_v10 = vpop.eup %2311  ;;  %v3122_v20 = vadd.f32 1.0, %v2310_v30 }
 0x200   : > { %2313 = vrcp.f32 %v1172_v14  ;;  %v3124_v45 = vadd.f32 1.0, %v2312_v10  ;;  %v1227_v37 = vand.u32 2147483647, %v1172_v14  ;;  %v1229_v22 = vand.u32 2147483648, %v1172_v14 }
 0x201   : > { %v1064_v46 = vpop.trf.xlu1  ;;  %2315 = vpow2.f32 %v2107_v18  ;;  %vm1223_vm1 = vweird.f32 %v1172_v14  ;;  %v1257_v56 = vand.u32 2147483647, %v3122_v20  ;;  %vm1253_vm4 = vweird.f32 %v3122_v20 }
 0x202   : > { %2317 = vpow2.f32 %v2109_v2  ;;  %v2111_v57 = vmul.f32 -1.442695, %v1064_v46  ;;  %vm3163_vm2 = vcmp.eq.f32.partialorder %v1227_v37, 8.507059e+37  ;;  %v1230_v13 = vor.u32 1.1754944e-38, %v1229_v22 }
 0x203   : > { %v1259_v5 = vand.u32 2147483648, %v3122_v20  ;;  %v1287_v23 = vand.u32 2147483647, %v3124_v45  ;;  %v1289_v36 = vand.u32 2147483648, %v3124_v45  ;;  %vm3186_vm9 = vcmp.eq.f32.partialorder %v1257_v56, 8.507059e+37 }
 0x204   : > { %2319 = vpow2.f32 %v2111_v57  ;;  %vm1283_vm7 = vweird.f32 %v3124_v45 }
 0x205   : > { %2321 = vrcp.f32 %v3122_v20  ;;  %vm3209_vm10 = vcmp.eq.f32.partialorder %v1287_v23, 8.507059e+37  ;;  %v1700_v23 = vld [vmem:[%s2877_s26 + $0x8] sm:$0xff] }
 0x206   : > { %v3126_v49 = vpop.eup %2313  ;;  %2323 = vrcp.f32 %v3124_v45 }
 0x207   : > { %v2316_v48 = vpop.eup %2315  ;;  %v1219_v26 = vmul.f32 %v3126_v49, %v1172_v14  ;;  %vm1224_vm0 = vweird.f32 %v3126_v49  ;;  %v1290_v14 = vor.u32 1.1754944e-38, %v1289_v36 }
 0x208   : > { %v2318_v29 = vpop.eup %2317  ;;  %v3132_v12 = vadd.f32 1.0, %v2316_v48  ;;  %vm3170_vm3 = vmor %vm1223_vm1, %vm1224_vm0 }
 0x209   : > { %v1065_v0 = vpop.trf.xlu1  ;;  %v3135_v31 = vadd.f32 1.0, %v2318_v29  ;;  %v1220_v40 = vsub.f32 1.0, %v1219_v26 }
 0x20a   : > { %v2320_v32 = vpop.eup %2319  ;;  %2325 = vrcp.f32 %v3132_v12  ;;  %v2113_v33 = vmul.f32 -1.442695, %v1065_v0  ;;  %vm1313_vm14 = vweird.f32 %v3132_v12 }
 0x20b   : > { %v3137_v50 = vpop.eup %2321  ;;  %2327 = vrcp.f32 %v3135_v31  ;;  %v3143_v63 = vadd.f32 1.0, %v2320_v32  ;;  %v1221_v44 = vmul.f32 %v3126_v49, %v1220_v40  ;;  %v1347_v26 = vand.u32 2147483647, %v3135_v31 }
 0x20c   : > { %v3140_v39 = vpop.eup %2323  ;;  %v1249_v41 = vmul.f32 %v3137_v50, %v3122_v20  ;;  %2329 = vpow2.f32 %v2113_v33  ;;  %vm1254_vm6 = vweird.f32 %v3137_v50  ;;  %v1349_v32 = vand.u32 2147483648, %v3135_v31 }
 0x20d   : > { %v1279_v35 = vmul.f32 %v3140_v39, %v3124_v45  ;;  %2331 = vrcp.f32 %v3143_v63  ;;  %v1222_v53 = vadd.f32 %v3126_v49, %v1221_v44  ;;  %vm1284_vm5 = vweird.f32 %v3140_v39  ;;  %vm3205_vm8 = vmor %vm1253_vm4, %vm1254_vm6 }
 0x20e   : > { %v1250_v58 = vsub.f32 1.0, %v1249_v41  ;;  %vm3215_vm11 = vmor %vm1283_vm7, %vm1284_vm5  ;;  %vm1343_vm0 = vweird.f32 %v3135_v31  ;;  %v1377_v37 = vand.u32 2147483647, %v3143_v63  ;;  %vm1373_vm4 = vweird.f32 %v3143_v63 }
 0x20f   : > { %v1280_v42 = vsub.f32 1.0, %v1279_v35  ;;  %v1226_v52 = vsel %vm3170_vm3, %v3126_v49, %v1222_v53 }
 0x210   : > { %v3152_v19 = vpop.eup %2325  ;;  %v1251_v16 = vmul.f32 %v3137_v50, %v1250_v58  ;;  %v3199_v15 = vsel %vm3163_vm2, %v1230_v13, %v1226_v52  ;;  %vm3266_vm2 = vcmp.eq.f32.partialorder %v1347_v26, 8.507059e+37  ;;  %vm3283_vm6 = vcmp.eq.f32.partialorder %v1377_v37, 8.507059e+37  ;;  %v1702_v26 = vld [vmem:[%s2877_s26 + $0x18] sm:$0xff] }
 0x211   : > { %v3116_v28 = vpop.trf.xlu1  ;;  %v3155_v27 = vpop.eup %2327  ;;  %v1309_v60 = vmul.f32 %v3152_v19, %v3132_v12  ;;  %v1281_v3 = vmul.f32 %v3140_v39, %v1280_v42  ;;  %vm1314_vm12 = vweird.f32 %v3152_v19 }
 0x212   : > { %v2330_v38 = vpop.eup %2329  ;;  %v1339_v55 = vmul.f32 %v3155_v27, %v3135_v31  ;;  %v2115_v47 = vmul.f32 -1.442695, %v3116_v28  ;;  %v1252_v0 = vadd.f32 %v3137_v50, %v1251_v16  ;;  %vm1344_vm13 = vweird.f32 %v3155_v27  ;;  %vm3248_vm15 = vmor %vm1313_vm14, %vm1314_vm12 }
 0x213   : > { %v3168_v1 = vpop.eup %2331  ;;  %v3181_v11 = vadd.f32 1.0, %v2330_v38  ;;  %v1310_v6 = vsub.f32 1.0, %v1309_v60  ;;  %v1282_v59 = vadd.f32 %v3140_v39, %v1281_v3  ;;  %vm3262_vm1 = vmor %vm1343_vm0, %vm1344_vm13  ;;  %v1350_v31 = vor.u32 1.1754944e-38, %v1349_v32 }
 0x214   : > { %v1340_v8 = vsub.f32 1.0, %v1339_v55  ;;  %v1369_v9 = vmul.f32 %v3168_v1, %v3143_v63  ;;  %v1256_v49 = vsel %vm3205_vm8, %v3137_v50, %v1252_v0  ;;  %vm1374_vm3 = vweird.f32 %v3168_v1 }
 0x215   : > { %v1311_v18 = vmul.f32 %v3152_v19, %v1310_v6  ;;  %v1286_v48 = vsel %vm3215_vm11, %v3140_v39, %v1282_v59  ;;  %v1407_v0 = vand.u32 2147483647, %v3181_v11  ;;  %vm1403_vm5 = vweird.f32 %v3181_v11 }
 0x216   : > { %v1341_v2 = vmul.f32 %v3155_v27, %v1340_v8  ;;  %v1370_v57 = vsub.f32 1.0, %v1369_v9  ;;  %v3257_v58 = vsel %vm3209_vm10, %v1290_v14, %v1286_v48 }
 0x217   : > { %v3233_v33 = vadd.f32 %v3152_v19, %v1311_v18  ;;  %vm3354_vm14 = vcmp.eq.f32.partialorder %v1407_v0, 8.507059e+37 }
 0x218   : > { %v1342_v40 = vadd.f32 %v3155_v27, %v1341_v2  ;;  %v1371_v39 = vmul.f32 %v3168_v1, %v1370_v57 }
 0x219   : > { %v1067_v17 = vpop.trf.xlu1  ;;  %v1316_v60 = vsel %vm3248_vm15, %v3152_v19, %v3233_v33 }
 0x21a   : > { %v2117_v43 = vmul.f32 -1.442695, %v1067_v17  ;;  %v1260_v17 = vor.u32 1.1754944e-38, %v1259_v5  ;;  %v1346_v55 = vsel %vm3262_vm1, %v3155_v27, %v1342_v40  ;;  %v1372_v4 = vadd.f32 %v3168_v1, %v1371_v39 }
 0x21b   : > { %v1351_v36 = vsel %vm3266_vm2, %v1350_v31, %v1346_v55 }
 0x21c   : > { %2333 = vpow2.f32 %v2117_v43  ;;  %v3246_v35 = vsel %vm3186_vm9, %v1260_v17, %v1256_v49  ;;  %v1317_v43 = vand.u32 2147483647, %v3132_v12  ;;  %vm3299_vm9 = vmor %vm1373_vm4, %vm1374_vm3  ;;  %v3310_v17 = vmul.f32 %v1700_v23, %v1351_v36 }
 0x221   : > { %v3120_v21 = vpop.trf.xlu1 }
 0x222   : > { %v2334_v46 = vpop.eup %2333  ;;  %v2119_v51 = vmul.f32 -1.442695, %v3120_v21 }
 0x223   : > { %v3219_v20 = vadd.f32 1.0, %v2334_v46  ;;  %v1376_v46 = vsel %vm3299_vm9, %v3168_v1, %v1372_v4 }
 0x225   : > { %vm1463_vm1 = vweird.f32 %v3219_v20 }
 0x229   : > { %v3129_v61 = vpop.trf.xlu1 }
 0x22a   : > { %v2121_v41 = vmul.f32 -1.442695, %v3129_v61  ;;  %v1319_v61 = vand.u32 2147483648, %v3132_v12 }
 0x231   : > { %v3145_v7 = vpop.trf.xlu1 }
 0x232   : > { %v2123_v59 = vmul.f32 -1.442695, %v3145_v7 }
 0x239   : > { %v1071_v24 = vpop.trf.xlu1 }
 0x23a   : > { %v2125_v62 = vmul.f32 -1.442695, %v1071_v24  ;;  %v1379_v24 = vand.u32 2147483648, %v3143_v63 }
 0x23c   : > { %2335 = vpow2.f32 %v2125_v62  ;;  %v1380_v34 = vor.u32 1.1754944e-38, %v1379_v24 }
 0x23d   : > { %2337 = vrcp.f32 %v3181_v11 }
 0x23e   : > { %2339 = vpow2.f32 %v2115_v47  ;;  %v1409_v47 = vand.u32 2147483648, %v3181_v11  ;;  %v1381_v18 = vsel %vm3283_vm6, %v1380_v34, %v1376_v46 }
 0x23f   : > { %2341 = vpow2.f32 %v2119_v51 }
 0x241   : > { %v1072_v21 = vpop.trf.xlu1 }
 0x242   : > { %v2336_v30 = vpop.eup %2335  ;;  %v2127_v45 = vmul.f32 -1.442695, %v1072_v21  ;;  %v3322_v21 = vor.u32 1.1754944e-38, %v1409_v47 }
 0x243   : > { %v3227_v29 = vadd.f32 1.0, %v2336_v30  ;;  %v3238_v50 = vpop.eup %2337 }
 0x244   : > { %2343 = vpow2.f32 %v2127_v45  ;;  %v2340_v22 = vpop.eup %2339  ;;  %v1399_v25 = vmul.f32 %v3238_v50, %v3181_v11  ;;  %vm1404_vm12 = vweird.f32 %v3238_v50 }
 0x245   : > { %2345 = vrcp.f32 %v3227_v29  ;;  %v2342_v38 = vpop.eup %2341  ;;  %v3287_v27 = vadd.f32 1.0, %v2340_v22  ;;  %v1589_v54 = vand.u32 2147483648, %v3227_v29  ;;  %v1587_v7 = vand.u32 2147483647, %v3227_v29  ;;  %vm3350_vm13 = vmor %vm1403_vm5, %vm1404_vm12 }
 0x246   : > { %2347 = vrcp.f32 %v3219_v20  ;;  %v3296_v6 = vadd.f32 1.0, %v2342_v38  ;;  %v1400_v9 = vsub.f32 1.0, %v1399_v25  ;;  %vm1583_vm8 = vweird.f32 %v3227_v29 }
 0x247   : > { %2349 = vpow2.f32 %v2121_v41  ;;  %v1439_v30 = vand.u32 2147483648, %v3287_v27  ;;  %v1590_v39 = vor.u32 1.1754944e-38, %v1589_v54  ;;  %vm1588_vm11 = vcmp.eq.f32.partialorder %v1587_v7, 8.507059e+37 }
 0x248   : > { %v1401_v2 = vmul.f32 %v3238_v50, %v1400_v9  ;;  %v3340_v38 = vmul.f32 %v1702_v26, %v1381_v18  ;;  %v1437_v55 = vand.u32 2147483647, %v3287_v27 }
 0x249   : > { %v1073_v56 = vpop.trf.xlu1 }
 0x24a   : > { %v2344_v62 = vpop.eup %2343  ;;  %v2129_v13 = vmul.f32 -1.442695, %v1073_v56  ;;  %v3343_v56 = vor.u32 1.1754944e-38, %v1439_v30 }
 0x24b   : > { %v2346_v16 = vpop.eup %2345  ;;  %v3289_v52 = vadd.f32 1.0, %v2344_v62 }
 0x24c   : > { %v3291_v5 = vpop.eup %2347  ;;  %v1579_v8 = vmul.f32 %v2346_v16, %v3227_v29  ;;  %2351 = vpow2.f32 %v2129_v13  ;;  %vm1584_vm7 = vweird.f32 %v2346_v16  ;;  %v1402_v29 = vadd.f32 %v3238_v50, %v1401_v2 }
 0x24d   : > { %2353 = vrcp.f32 %v3289_v52  ;;  %v1459_v28 = vmul.f32 %v3291_v5, %v3219_v20  ;;  %v2350_v14 = vpop.eup %2349  ;;  %vm1585_vm10 = vmor %vm1583_vm8, %vm1584_vm7  ;;  %v1619_v4 = vand.u32 2147483648, %v3289_v52  ;;  %vm1464_vm2 = vweird.f32 %v3291_v5 }
 0x24e   : > { %v1580_v51 = vsub.f32 1.0, %v1579_v8  ;;  %2355 = vrcp.f32 %v3287_v27  ;;  %v3327_v40 = vadd.f32 1.0, %v2350_v14  ;;  %v1617_v8 = vand.u32 2147483647, %v3289_v52  ;;  %vm3385_vm9 = vmor %vm1463_vm1, %vm1464_vm2 }
 0x24f   : > { %2357 = vrcp.f32 %v3296_v6  ;;  %v1460_v32 = vsub.f32 1.0, %v1459_v28  ;;  %v1406_v63 = vsel %vm3350_vm13, %v3238_v50, %v1402_v29  ;;  %vm1613_vm3 = vweird.f32 %v3289_v52 }
 0x250   : > { %v1581_v1 = vmul.f32 %v2346_v16, %v1580_v51  ;;  %2359 = vpow2.f32 %v2123_v59  ;;  %v1620_v51 = vor.u32 1.1754944e-38, %v1619_v4  ;;  %vm1618_vm6 = vcmp.eq.f32.partialorder %v1617_v8, 8.507059e+37  ;;  %v1704_v8 = vld [vmem:[%s2877_s26 + $0x28] sm:$0xff] }
 0x251   : > { %v1074_v10 = vpop.trf.xlu1  ;;  %v1461_v62 = vmul.f32 %v3291_v5, %v1460_v32  ;;  %v1411_v32 = vsel %vm3354_vm14, %v3322_v21, %v1406_v63  ;;  %vm1433_vm8 = vweird.f32 %v3287_v27  ;;  %v1499_v63 = vand.u32 2147483648, %v3296_v6 }
 0x252   : > { %v2352_v57 = vpop.eup %2351  ;;  %v1582_v45 = vadd.f32 %v2346_v16, %v1581_v1  ;;  %v2131_v49 = vmul.f32 -1.442695, %v1074_v10 }
 0x253   : > { %v2354_v48 = vpop.eup %2353  ;;  %v3330_v41 = vadd.f32 1.0, %v2352_v57  ;;  %v1462_v59 = vadd.f32 %v3291_v5, %v1461_v62 }
 0x254   : > { %v1586_v37 = vsel %vm1585_vm10, %v2346_v16, %v1582_v45  ;;  %v1609_v22 = vmul.f32 %v2354_v48, %v3289_v52  ;;  %2361 = vpow2.f32 %v2131_v49  ;;  %v3333_v42 = vpop.eup %2355  ;;  %vm1614_vm0 = vweird.f32 %v2354_v48 }
 0x255   : > { %v1591_v53 = vsel %vm1588_vm11, %v1590_v39, %v1586_v37  ;;  %2363 = vrcp.f32 %v3330_v41  ;;  %v3338_v31 = vpop.eup %2357  ;;  %v1429_v11 = vmul.f32 %v3333_v42, %v3287_v27  ;;  %vm1615_vm4 = vmor %vm1613_vm3, %vm1614_vm0  ;;  %v1469_v52 = vand.u32 2147483648, %v3219_v20 }
 0x256   : > { %v1684_v24 = vmul.f32 2.0, %v1591_v53  ;;  %v1610_v25 = vsub.f32 1.0, %v1609_v22  ;;  %2365 = vrcp.f32 %v3327_v40  ;;  %v2360_v13 = vpop.eup %2359  ;;  %v1489_v34 = vmul.f32 %v3338_v31, %v3296_v6 }
 0x257   : > { %v3371_v50 = vadd.f32 1.0, %v2360_v13  ;;  %v1430_v57 = vsub.f32 1.0, %v1429_v11  ;;  %vm1434_vm5 = vweird.f32 %v3333_v42  ;;  %v1466_v45 = vsel %vm3385_vm9, %v3291_v5, %v1462_v59 }
 0x258   : > { %v2133_v23 = vadd.f32 -1.0, %v1684_v24  ;;  %v1611_v36 = vmul.f32 %v2354_v48, %v1610_v25  ;;  %v1490_v7 = vsub.f32 1.0, %v1489_v34  ;;  %v1649_v49 = vand.u32 2147483648, %v3330_v41  ;;  %vm3440_vm3 = vmor %vm1433_vm8, %vm1434_vm5 }
 0x259   : > { %v1470_v39 = vor.u32 1.1754944e-38, %v1469_v52  ;;  %vm1643_vm11 = vweird.f32 %v3330_v41  ;;  %v1431_v24 = vmul.f32 %v3333_v42, %v1430_v57  ;;  %vm1494_vm12 = vweird.f32 %v3338_v31 }
 0x25a   : > { %v2362_v9 = vpop.eup %2361  ;;  %v1716_v47 = vmul.f32 %v2133_v23, %v3199_v15  ;;  %v1612_v46 = vadd.f32 %v2354_v48, %v1611_v36  ;;  %v1491_v37 = vmul.f32 %v3338_v31, %v1490_v7  ;;  %v1650_v21 = vor.u32 1.1754944e-38, %v1649_v49 }
 0x25b   : > { %v2364_v0 = vpop.eup %2363  ;;  %v3373_v28 = vadd.f32 1.0, %v2362_v9  ;;  %vm1493_vm0 = vweird.f32 %v3296_v6  ;;  %v1497_v9 = vand.u32 2147483647, %v3296_v6  ;;  %v1500_v7 = vor.u32 1.1754944e-38, %v1499_v63 }
 0x25c   : > { %v1724_v54 = vadd.f32 %v1716_v47, %v3310_v17  ;;  %v1616_v14 = vsel %vm1615_vm4, %v2354_v48, %v1612_v46  ;;  %v1639_v1 = vmul.f32 %v2364_v0, %v3330_v41  ;;  %v3377_v15 = vpop.eup %2365  ;;  %v1467_v17 = vand.u32 2147483647, %v3219_v20  ;;  %vm3425_vm1 = vmor %vm1493_vm0, %vm1494_vm12 }
 0x25d   : > { %v1621_v18 = vsel %vm1618_vm6, %v1620_v51, %v1616_v14  ;;  %2367 = vrcp.f32 %v3373_v28  ;;  %vm1644_vm7 = vweird.f32 %v2364_v0  ;;  %v1647_v20 = vand.u32 2147483647, %v3330_v41 }
 0x25e   : > { %2369 = vtanh.f32 %v1724_v54  ;;  %1756 = vst [vmem:[%s2944_s29 + $0x48] sm:$0xff] %v1724_v54  ;;  %v1686_v30 = vmul.f32 2.0, %v1621_v18  ;;  %v1640_v10 = vsub.f32 1.0, %v1639_v1  ;;  %v1519_v5 = vmul.f32 %v3377_v15, %v3327_v40  ;;  %vm1645_vm13 = vmor %vm1643_vm11, %vm1644_vm7 }
 0x25f   : > { %2371 = vrcp.f32 %v3371_v50  ;;  %vm1468_vm10 = vcmp.eq.f32.partialorder %v1467_v17, 8.507059e+37  ;;  %vm1648_vm14 = vcmp.eq.f32.partialorder %v1647_v20, 8.507059e+37  ;;  %v1492_v16 = vadd.f32 %v3338_v31, %v1491_v37 }
 0x260   : > { %v2135_v48 = vadd.f32 -1.0, %v1686_v30  ;;  %v1641_v26 = vmul.f32 %v2364_v0, %v1640_v10  ;;  %v1471_v25 = vsel %vm1468_vm10, %v1470_v39, %v1466_v45  ;;  %v1520_v3 = vsub.f32 1.0, %v1519_v5 }
 0x261   : > { %v1679_v47 = vand.u32 2147483648, %v3373_v28  ;;  %v1677_v51 = vand.u32 2147483647, %v3373_v28  ;;  %v1712_v54 = vmul.f32 %v1704_v8, %v1411_v32  ;;  %v1496_v14 = vsel %vm3425_vm1, %v3338_v31, %v1492_v16  ;;  %v1706_v32 = vld [vmem:[%s2877_s26 + $0x38] sm:$0xff] }
 0x262   : > { %v1718_v22 = vmul.f32 %v2135_v48, %v3246_v35  ;;  %v1642_v29 = vadd.f32 %v2364_v0, %v1641_v26  ;;  %v1521_v6 = vmul.f32 %v3377_v15, %v1520_v3  ;;  %vm1673_vm4 = vweird.f32 %v3373_v28 }
 0x263   : > { %v2368_v53 = vpop.eup %2367  ;;  %vm1498_vm6 = vcmp.eq.f32.partialorder %v1497_v9, 8.507059e+37  ;;  %vm1524_vm9 = vweird.f32 %v3377_v15  ;;  %v1680_v17 = vor.u32 1.1754944e-38, %v1679_v47  ;;  %vm1678_vm5 = vcmp.eq.f32.partialorder %v1677_v51, 8.507059e+37 }
 0x264   : > { %v2370_v62 = vpop.eup %2369  ;;  %v1726_v4 = vadd.f32 %v1718_v22, %v3340_v38  ;;  %v1646_v13 = vsel %vm1645_vm13, %v2364_v0, %v1642_v29  ;;  %v1669_v35 = vmul.f32 %v2368_v53, %v3373_v28  ;;  %v1432_v38 = vadd.f32 %v3333_v42, %v1431_v24 }
 0x265   : > { %v3412_v41 = vpop.eup %2371  ;;  %v1740_v23 = vmul.f32 %v2370_v62, %v1471_v25  ;;  %v1651_v36 = vsel %vm1648_vm14, %v1650_v21, %v1646_v13  ;;  %vm1674_vm2 = vweird.f32 %v2368_v53  ;;  %v1501_v10 = vsel %vm1498_vm6, %v1500_v7, %v1496_v14 }
 0x266   : > { %2373 = vtanh.f32 %v1726_v4  ;;  %1758 = vst [vmem:[%s2944_s29 + $0x58] sm:$0xff] %v1726_v4  ;;  %v1688_v11 = vmul.f32 2.0, %v1651_v36  ;;  %v1670_v34 = vsub.f32 1.0, %v1669_v35  ;;  %v1549_v1 = vmul.f32 %v3412_v41, %v3371_v50  ;;  %vm1675_vm7 = vmor %vm1673_vm4, %vm1674_vm2 }
 0x267   : > { %1748 = vst [vmem:[%s2944_s29 + $0x8] sm:$0xff] %v1740_v23  ;;  %v1436_v31 = vsel %vm3440_vm3, %v3333_v42, %v1432_v38  ;;  %vm1438_vm8 = vcmp.eq.f32.partialorder %v1437_v55, 8.507059e+37  ;;  %v1529_v42 = vand.u32 2147483648, %v3327_v40  ;;  %v1320_v20 = vor.u32 1.1754944e-38, %v1319_v61 }
 0x268   : > { %v2137_v0 = vadd.f32 -1.0, %v1688_v11  ;;  %v1671_v59 = vmul.f32 %v2368_v53, %v1670_v34  ;;  %v1550_v28 = vsub.f32 1.0, %v1549_v1  ;;  %v1441_v39 = vsel %vm1438_vm8, %v3343_v56, %v1436_v31 }
 0x269   : > { %vm1523_vm10 = vweird.f32 %v3327_v40  ;;  %v1527_v37 = vand.u32 2147483647, %v3327_v40  ;;  %vm1318_vm11 = vcmp.eq.f32.partialorder %v1317_v43, 8.507059e+37  ;;  %v1714_v40 = vmul.f32 %v1706_v32, %v1441_v39 }
 0x26a   : > { %v1720_v18 = vmul.f32 %v2137_v0, %v3257_v58  ;;  %v1672_v2 = vadd.f32 %v2368_v53, %v1671_v59  ;;  %v1522_v58 = vadd.f32 %v3377_v15, %v1521_v6  ;;  %vm1525_vm12 = vmor %vm1523_vm10, %vm1524_vm9  ;;  %v1321_v61 = vsel %vm1318_vm11, %v1320_v20, %v1316_v60 }
 0x26b   : > { %v1551_v56 = vmul.f32 %v3412_v41, %v1550_v28  ;;  %v1530_v5 = vor.u32 1.1754944e-38, %v1529_v42  ;;  %vm1528_vm13 = vcmp.eq.f32.partialorder %v1527_v37, 8.507059e+37  ;;  %vm1554_vm14 = vweird.f32 %v3412_v41 }
 0x26c   : > { %v2374_v30 = vpop.eup %2373  ;;  %v1728_v57 = vadd.f32 %v1720_v18, %v1712_v54  ;;  %v1676_v45 = vsel %vm1675_vm7, %v2368_v53, %v1672_v2  ;;  %v1526_v55 = vsel %vm1525_vm12, %v3377_v15, %v1522_v58  ;;  %v1559_v33 = vand.u32 2147483648, %v3371_v50 }
 0x26d   : > { %v1742_v49 = vmul.f32 %v2374_v30, %v1501_v10  ;;  %v1681_v48 = vsel %vm1678_vm5, %v1680_v17, %v1676_v45  ;;  %v1531_v22 = vsel %vm1528_vm13, %v1530_v5, %v1526_v55  ;;  %v1552_v53 = vadd.f32 %v3412_v41, %v1551_v56 }
 0x26e   : > { %2375 = vtanh.f32 %v1728_v57  ;;  %1760 = vst [vmem:[%s2944_s29 + $0x68] sm:$0xff] %v1728_v57  ;;  %v1690_v26 = vmul.f32 2.0, %v1681_v48  ;;  %vm1553_vm15 = vweird.f32 %v3371_v50  ;;  %v1557_v44 = vand.u32 2147483647, %v3371_v50 }
 0x26f   : > { %1750 = vst [vmem:[%s2944_s29 + $0x18] sm:$0xff] %v1742_v49  ;;  %vm1555_vm0 = vmor %vm1553_vm15, %vm1554_vm14  ;;  %v1560_v15 = vor.u32 1.1754944e-38, %v1559_v33 }
 0x270   : > { %v2139_v27 = vadd.f32 -1.0, %v1690_v26  ;;  %v1556_v60 = vsel %vm1555_vm0, %v3412_v41, %v1552_v53  ;;  %vm1558_vm1 = vcmp.eq.f32.partialorder %v1557_v44, 8.507059e+37 }
 0x271   : > { %v1561_v25 = vsel %vm1558_vm1, %v1560_v15, %v1556_v60 }
 0x272   : > { %v1722_v12 = vmul.f32 %v2139_v27, %v1321_v61 }
 0x274   : > { %v2376_v43 = vpop.eup %2375  ;;  %v1730_v29 = vadd.f32 %v1722_v12, %v1714_v40 }
 0x275   : > { %v1744_v19 = vmul.f32 %v2376_v43, %v1531_v22 }
 0x276   : > { %2377 = vtanh.f32 %v1730_v29  ;;  %1762 = vst [vmem:[%s2944_s29 + $0x78] sm:$0xff] %v1730_v29 }
 0x277   : > { %1752 = vst [vmem:[%s2944_s29 + $0x28] sm:$0xff] %v1744_v19 }
 0x27c   : > { %v2378_v24 = vpop.eup %2377 }
 0x27d   : > { %v1746_v21 = vmul.f32 %v2378_v24, %v1561_v25 }
 0x27f   : > { %1754 = vst [vmem:[%s2944_s29 + $0x38] sm:$0xff] %v1746_v21 }
 0x280 PF: > { %s14_s15 = sadd.s32 1, %s2385_s15  }
 0x281   : > { %p11_p4 = scmp.ge.s32.totalorder %s14_s15, 4  }
 0x283   :  { %13 = sbr.rel (!%p11_p4) target bundleno = 1 (0x1), region = 71 }

</bundles_post_ra>
